<compile_context>
chip_gen: v7x
topology: tpu7x:2x2x1
jax: 0.10.0
libtpu: 0.0.40
codegen_flags: <defaults>
</compile_context>

<pallas_src>
import functools

import jax
import jax.numpy as jnp
from jax.experimental import pallas as pl
from jax.experimental.pallas import tpu as pltpu

H_SIZE = 768   # module hard-codes _h_size = 768
EPS = 1e-8     # torch cosine_similarity default eps


def _cosine_mse_kernel(rep_a_ref, rep_b_ref, w1_ref, b1_ref, w2_ref, b2_ref,
                       labels_ref, out_ref, sse_ref, *, batch, tile_b):
    i = pl.program_id(0)

    @pl.when(i == 0)
    def _():
        sse_ref[0] = 0.0

    # MXU matmuls: bf16 operands, f32 accumulation; bias add + rest in f32.
    fin_a = jnp.dot(rep_a_ref[...], w1_ref[...],
                    preferred_element_type=jnp.float32) + b1_ref[...]
    fin_b = jnp.dot(rep_b_ref[...], w2_ref[...],
                    preferred_element_type=jnp.float32) + b2_ref[...]

    # Fused row reductions: one XLU cross-lane reduce for all three sums.
    prods = jnp.concatenate([fin_a * fin_b, fin_a * fin_a, fin_b * fin_b],
                            axis=0)                               # (3*tb, H)
    sums = jnp.sum(prods, axis=-1, keepdims=True)                 # (3*tb, 1)
    w12 = sums[:tile_b]
    wa = sums[tile_b:2 * tile_b]
    wb = sums[2 * tile_b:]

    # cosine similarity (torch dim=1 semantics); rsqrt goes to the EUP slot.
    cos = w12 * jax.lax.rsqrt(jnp.maximum(wa * wb, EPS * EPS))    # (tb, 1)

    # Mask rows added by batch padding (batch may not divide the tile size).
    row = i * tile_b + jax.lax.broadcasted_iota(jnp.int32, (tile_b, 1), 0)
    diff = jnp.where(row < batch, cos - labels_ref[...], 0.0)

    sse_ref[0] += jnp.sum(diff * diff)

    @pl.when(i == pl.num_programs(0) - 1)
    def _():
        out_ref[0, 0] = sse_ref[0] * (1.0 / batch)


def cosine_mse_align_loss(rep_a, rep_b, w_par1, b_par1, w_par2, b_par2, labels,
                          *, tile_b=256, use_bf16=True):
    """rep_a, rep_b: (B, H). w_par*: (H, H) stored as (in, out). b_par*: (H,).
    labels: (B,). Returns scalar f32 loss (MSE of cosine similarity vs labels)."""
    B, H = rep_a.shape

    mm_dtype = jnp.bfloat16 if use_bf16 else jnp.float32
    rep_a = rep_a.astype(mm_dtype)
    rep_b = rep_b.astype(mm_dtype)
    w1 = w_par1.astype(mm_dtype)
    w2 = w_par2.astype(mm_dtype)
    b1 = b_par1.reshape(1, H).astype(jnp.float32)
    b2 = b_par2.reshape(1, H).astype(jnp.float32)

    # Sublane-aligned batch tile; pad batch to a whole number of tiles.
    b_pad8 = pl.cdiv(B, 8) * 8
    tb = max(8, (min(tile_b, b_pad8) // 8) * 8)
    num_tiles = pl.cdiv(B, tb)
    b_pad = num_tiles * tb

    pad = b_pad - B
    if pad:
        rep_a = jnp.pad(rep_a, ((0, pad), (0, 0)))
        rep_b = jnp.pad(rep_b, ((0, pad), (0, 0)))
        labels = jnp.pad(labels, ((0, pad),))
    lab = labels.reshape(b_pad, 1).astype(jnp.float32)

    kernel = functools.partial(_cosine_mse_kernel, batch=B, tile_b=tb)

    grid_spec = pltpu.PrefetchScalarGridSpec(
        num_scalar_prefetch=0,
        grid=(num_tiles,),
        in_specs=[
            pl.BlockSpec((tb, H), lambda i: (i, 0)),   # rep_a tile (streamed)
            pl.BlockSpec((tb, H), lambda i: (i, 0)),   # rep_b tile (streamed)
            pl.BlockSpec((H, H), lambda i: (0, 0)),    # W1 resident across grid
            pl.BlockSpec((1, H), lambda i: (0, 0)),    # b1 resident
            pl.BlockSpec((H, H), lambda i: (0, 0)),    # W2 resident
            pl.BlockSpec((1, H), lambda i: (0, 0)),    # b2 resident
            pl.BlockSpec((tb, 1), lambda i: (i, 0)),   # labels tile (streamed)
        ],
        out_specs=pl.BlockSpec(memory_space=pltpu.MemorySpace.SMEM),
        scratch_shapes=[pltpu.SMEM((1,), jnp.float32)],   # running SSE
    )

    out = pl.pallas_call(
        kernel,
        out_shape=jax.ShapeDtypeStruct((1, 1), jnp.float32),
        grid_spec=grid_spec,
        compiler_params=pltpu.CompilerParams(
            dimension_semantics=("arbitrary",)),
    )(rep_a, rep_b, w1, b1, w2, b2, lab)
    return out[0, 0]


def _reference_loss(rep_a, rep_b, w1, b1, w2, b2, labels):
    hp = jax.lax.Precision.HIGHEST
    fin_a = jnp.dot(rep_a, w1, precision=hp) + b1
    fin_b = jnp.dot(rep_b, w2, precision=hp) + b2
    w12 = jnp.sum(fin_a * fin_b, axis=-1)
    wa = jnp.sum(fin_a * fin_a, axis=-1)
    wb = jnp.sum(fin_b * fin_b, axis=-1)
    cos = w12 / jnp.sqrt(jnp.maximum(wa * wb, EPS * EPS))
    return jnp.mean((cos - labels) ** 2)


if __name__ == "__main__":
    B = 16   # small batch of sentence-embedding pairs
    H = H_SIZE

    key = jax.random.PRNGKey(0)
    k_a, k_b, k_w1, k_b1, k_w2, k_b2, k_lab = jax.random.split(key, 7)

    rep_a = jax.random.normal(k_a, (B, H), dtype=jnp.float32)
    rep_b = jax.random.normal(k_b, (B, H), dtype=jnp.float32)

    # nn.Linear(768, 768)-shaped parameters (stored as (in, out)).
    bound = 1.0 / jnp.sqrt(jnp.float32(H))
    w_par1 = jax.random.uniform(k_w1, (H, H), jnp.float32, -bound, bound)
    b_par1 = jax.random.uniform(k_b1, (H,), jnp.float32, -bound, bound)
    w_par2 = jax.random.uniform(k_w2, (H, H), jnp.float32, -bound, bound)
    b_par2 = jax.random.uniform(k_b2, (H,), jnp.float32, -bound, bound)

    labels = jax.random.uniform(k_lab, (B,), jnp.float32, 0.0, 1.0)

    # tile_b=8 -> 2 grid steps at B=16 to exercise the streaming/accumulate path.
    loss = cosine_mse_align_loss(rep_a, rep_b, w_par1, b_par1, w_par2, b_par2,
                                 labels, tile_b=8)
    loss = jax.block_until_ready(loss)

    # Apples-to-apples reference: same bf16-rounded matmul inputs, f32 math.
    ref_bf16 = _reference_loss(
        rep_a.astype(jnp.bfloat16).astype(jnp.float32),
        rep_b.astype(jnp.bfloat16).astype(jnp.float32),
        w_par1.astype(jnp.bfloat16).astype(jnp.float32), b_par1,
        w_par2.astype(jnp.bfloat16).astype(jnp.float32), b_par2, labels)
    # Full-f32 reference as a loose sanity check on the bf16 approximation.
    ref_f32 = _reference_loss(rep_a, rep_b, w_par1, b_par1, w_par2, b_par2, labels)

    assert jnp.allclose(loss, ref_bf16, rtol=2e-3, atol=1e-4), (loss, ref_bf16)
    assert jnp.allclose(loss, ref_f32, rtol=1e-1, atol=1e-2), (loss, ref_f32)

    print("KERNEL_OK")
</pallas_src>

<mosaic_0001>
module attributes {stable_mosaic.version = 11 : i64} {
  func.func @_cosine_mse_kernel(%arg0: i32, %arg1: memref<8x768xbf16, #tpu.memory_space<vmem>>, %arg2: memref<8x768xbf16, #tpu.memory_space<vmem>>, %arg3: memref<768x768xbf16, #tpu.memory_space<vmem>>, %arg4: memref<1x768xf32, #tpu.memory_space<vmem>>, %arg5: memref<768x768xbf16, #tpu.memory_space<vmem>>, %arg6: memref<1x768xf32, #tpu.memory_space<vmem>>, %arg7: memref<8x1xf32, #tpu.memory_space<vmem>>, %arg8: memref<1x1xf32, #tpu.memory_space<smem>>, %arg9: memref<1xf32, #tpu.memory_space<smem>>) attributes {dimension_semantics = [#tpu.dimension_semantics<arbitrary>], iteration_bounds = array<i64: 2>, scalar_prefetch = 0 : i64, scratch_operands = 1 : i64, tpu.core_type = #tpu.core_type<tc>, window_params = [{transform_indices = @transform_0, window_bounds = array<i64: 8, 768>}, {transform_indices = @transform_1, window_bounds = array<i64: 8, 768>}, {pipeline_mode = #tpu.pipeline_mode<synchronous>, transform_indices = @transform_2, window_bounds = array<i64: 768, 768>}, {pipeline_mode = #tpu.pipeline_mode<synchronous>, transform_indices = @transform_3, window_bounds = array<i64: 1, 768>}, {pipeline_mode = #tpu.pipeline_mode<synchronous>, transform_indices = @transform_4, window_bounds = array<i64: 768, 768>}, {pipeline_mode = #tpu.pipeline_mode<synchronous>, transform_indices = @transform_5, window_bounds = array<i64: 1, 768>}, {transform_indices = @transform_6, window_bounds = array<i64: 8, 1>}, {transform_indices = @transform_7, window_bounds = array<i64: 1, 1>}]} {
    %c0_i32 = arith.constant 0 : i32
    %0 = arith.cmpi eq, %arg0, %c0_i32 : i32
    %1 = arith.extui %0 : i1 to i32
    %c0_i32_0 = arith.constant 0 : i32
    %2 = arith.cmpi ne, %1, %c0_i32_0 : i32
    scf.if %2 {
      %cst_22 = arith.constant 0.000000e+00 : f32
      %c0_23 = arith.constant 0 : index
      %50 = memref.load %arg9[%c0_23] : memref<1xf32, #tpu.memory_space<smem>>
      memref.store %cst_22, %arg9[%c0_23] : memref<1xf32, #tpu.memory_space<smem>>
    } else {
    }
    %c0 = arith.constant 0 : index
    %c0_1 = arith.constant 0 : index
    %3 = vector.load %arg1[%c0, %c0_1] : memref<8x768xbf16, #tpu.memory_space<vmem>>, vector<8x768xbf16>
    %c0_2 = arith.constant 0 : index
    %c0_3 = arith.constant 0 : index
    %4 = vector.load %arg3[%c0_2, %c0_3] : memref<768x768xbf16, #tpu.memory_space<vmem>>, vector<768x768xbf16>
    %cst = arith.constant dense<0.000000e+00> : vector<8x768xf32>
    %5 = tpu.matmul %3, %4, %cst {dimension_numbers = #tpu.dot_dimension_numbers<[1], [0], [0], [1], [0, 0, 1, 1], [], []>} : vector<8x768xbf16>, vector<768x768xbf16>, vector<8x768xf32> -> vector<8x768xf32>
    %c0_4 = arith.constant 0 : index
    %c0_5 = arith.constant 0 : index
    %6 = vector.load %arg4[%c0_4, %c0_5] : memref<1x768xf32, #tpu.memory_space<vmem>>, vector<1x768xf32>
    %7 = vector.broadcast %6 : vector<1x768xf32> to vector<8x768xf32>
    %8 = arith.addf %5, %7 : vector<8x768xf32>
    %c0_6 = arith.constant 0 : index
    %c0_7 = arith.constant 0 : index
    %9 = vector.load %arg2[%c0_6, %c0_7] : memref<8x768xbf16, #tpu.memory_space<vmem>>, vector<8x768xbf16>
    %c0_8 = arith.constant 0 : index
    %c0_9 = arith.constant 0 : index
    %10 = vector.load %arg5[%c0_8, %c0_9] : memref<768x768xbf16, #tpu.memory_space<vmem>>, vector<768x768xbf16>
    %cst_10 = arith.constant dense<0.000000e+00> : vector<8x768xf32>
    %11 = tpu.matmul %9, %10, %cst_10 {dimension_numbers = #tpu.dot_dimension_numbers<[1], [0], [0], [1], [0, 0, 1, 1], [], []>} : vector<8x768xbf16>, vector<768x768xbf16>, vector<8x768xf32> -> vector<8x768xf32>
    %c0_11 = arith.constant 0 : index
    %c0_12 = arith.constant 0 : index
    %12 = vector.load %arg6[%c0_11, %c0_12] : memref<1x768xf32, #tpu.memory_space<vmem>>, vector<1x768xf32>
    %13 = vector.broadcast %12 : vector<1x768xf32> to vector<8x768xf32>
    %14 = arith.addf %11, %13 : vector<8x768xf32>
    %15 = arith.mulf %8, %14 : vector<8x768xf32>
    %16 = arith.mulf %8, %8 : vector<8x768xf32>
    %17 = arith.mulf %14, %14 : vector<8x768xf32>
    %18 = tpu.concatenate %15, %16, %17 in 0 : vector<8x768xf32>, vector<8x768xf32>, vector<8x768xf32> -> vector<24x768xf32>
    %cst_13 = arith.constant dense<0.000000e+00> : vector<24xf32>
    %19 = vector.multi_reduction <add>, %18, %cst_13 [1] : vector<24x768xf32> to vector<24xf32>
    %20 = vector.shape_cast %19 : vector<24xf32> to vector<24x1xf32>
    %21 = vector.extract_strided_slice %20 {offsets = [0, 0], sizes = [8, 1], strides = [1, 1]} : vector<24x1xf32> to vector<8x1xf32>
    %22 = vector.extract_strided_slice %20 {offsets = [8, 0], sizes = [8, 1], strides = [1, 1]} : vector<24x1xf32> to vector<8x1xf32>
    %23 = vector.extract_strided_slice %20 {offsets = [16, 0], sizes = [8, 1], strides = [1, 1]} : vector<24x1xf32> to vector<8x1xf32>
    %24 = arith.mulf %22, %23 : vector<8x1xf32>
    %cst_14 = arith.constant 1.000000e-16 : f32
    %25 = vector.broadcast %cst_14 : f32 to vector<8x1xf32>
    %26 = arith.maximumf %24, %25 : vector<8x1xf32>
    %27 = math.rsqrt %26 : vector<8x1xf32>
    %28 = arith.mulf %21, %27 : vector<8x1xf32>
    %c8_i32 = arith.constant 8 : i32
    %29 = arith.muli %arg0, %c8_i32 : i32
    %30 = tpu.iota {dimensions = array<i32: 0>} : vector<8x1xi32>
    %31 = vector.broadcast %29 : i32 to vector<8x1xi32>
    %32 = arith.addi %31, %30 : vector<8x1xi32>
    %c16_i32 = arith.constant 16 : i32
    %33 = vector.broadcast %c16_i32 : i32 to vector<8x1xi32>
    %34 = arith.cmpi slt, %32, %33 : vector<8x1xi32>
    %c0_15 = arith.constant 0 : index
    %c0_16 = arith.constant 0 : index
    %35 = vector.load %arg7[%c0_15, %c0_16] : memref<8x1xf32, #tpu.memory_space<vmem>>, vector<8x1xf32>
    %36 = arith.subf %28, %35 : vector<8x1xf32>
    %cst_17 = arith.constant 0.000000e+00 : f32
    %37 = vector.broadcast %cst_17 : f32 to vector<8x1xf32>
    %38 = arith.select %34, %36, %37 : vector<8x1xi1>, vector<8x1xf32>
    %c0_18 = arith.constant 0 : index
    %39 = memref.load %arg9[%c0_18] : memref<1xf32, #tpu.memory_space<smem>>
    %40 = arith.mulf %38, %38 : vector<8x1xf32>
    %41 = vector.shape_cast %40 : vector<8x1xf32> to vector<1x8x1xf32>
    %cst_19 = arith.constant dense<0.000000e+00> : vector<1xf32>
    %42 = vector.multi_reduction <add>, %41, %cst_19 [1, 2] : vector<1x8x1xf32> to vector<1xf32>
    %43 = vector.shape_cast %42 : vector<1xf32> to vector<1x1x1xf32>
    %44 = vector.extract %43[0, 0, 0] : f32 from vector<1x1x1xf32>
    %45 = arith.addf %39, %44 : f32
    %c0_20 = arith.constant 0 : index
    %46 = memref.load %arg9[%c0_20] : memref<1xf32, #tpu.memory_space<smem>>
    memref.store %45, %arg9[%c0_20] : memref<1xf32, #tpu.memory_space<smem>>
    %c1_i32 = arith.constant 1 : i32
    %47 = arith.cmpi eq, %arg0, %c1_i32 : i32
    %48 = arith.extui %47 : i1 to i32
    %c0_i32_21 = arith.constant 0 : i32
    %49 = arith.cmpi ne, %48, %c0_i32_21 : i32
    scf.if %49 {
      %c0_22 = arith.constant 0 : index
      %50 = memref.load %arg9[%c0_22] : memref<1xf32, #tpu.memory_space<smem>>
      %cst_23 = arith.constant 6.250000e-02 : f32
      %51 = arith.mulf %50, %cst_23 : f32
      %c0_24 = arith.constant 0 : index
      %c0_25 = arith.constant 0 : index
      %52 = memref.load %arg8[%c0_24, %c0_25] : memref<1x1xf32, #tpu.memory_space<smem>>
      memref.store %51, %arg8[%c0_24, %c0_25] : memref<1x1xf32, #tpu.memory_space<smem>>
    } else {
    }
    return
  }
  func.func @transform_0(%arg0: i32) -> (i32, i32) {
    %c0_i32 = arith.constant 0 : i32
    %c0_i32_0 = arith.constant 0 : i32
    return %arg0, %c0_i32 : i32, i32
  }
  func.func @transform_1(%arg0: i32) -> (i32, i32) {
    %c0_i32 = arith.constant 0 : i32
    %c0_i32_0 = arith.constant 0 : i32
    return %arg0, %c0_i32 : i32, i32
  }
  func.func @transform_2(%arg0: i32) -> (i32, i32) {
    %c0_i32 = arith.constant 0 : i32
    %c0_i32_0 = arith.constant 0 : i32
    %c0_i32_1 = arith.constant 0 : i32
    return %c0_i32, %c0_i32_0 : i32, i32
  }
  func.func @transform_3(%arg0: i32) -> (i32, i32) {
    %c0_i32 = arith.constant 0 : i32
    %c0_i32_0 = arith.constant 0 : i32
    %c0_i32_1 = arith.constant 0 : i32
    return %c0_i32, %c0_i32_0 : i32, i32
  }
  func.func @transform_4(%arg0: i32) -> (i32, i32) {
    %c0_i32 = arith.constant 0 : i32
    %c0_i32_0 = arith.constant 0 : i32
    %c0_i32_1 = arith.constant 0 : i32
    return %c0_i32, %c0_i32_0 : i32, i32
  }
  func.func @transform_5(%arg0: i32) -> (i32, i32) {
    %c0_i32 = arith.constant 0 : i32
    %c0_i32_0 = arith.constant 0 : i32
    %c0_i32_1 = arith.constant 0 : i32
    return %c0_i32, %c0_i32_0 : i32, i32
  }
  func.func @transform_6(%arg0: i32) -> (i32, i32) {
    %c0_i32 = arith.constant 0 : i32
    %c0_i32_0 = arith.constant 0 : i32
    return %arg0, %c0_i32 : i32, i32
  }
  func.func @transform_7(%arg0: i32) -> (i32, i32) {
    %c0_i32 = arith.constant 0 : i32
    %c0_i32_0 = arith.constant 0 : i32
    %c0_i32_1 = arith.constant 0 : i32
    return %c0_i32, %c0_i32_0 : i32, i32
  }
}

</mosaic_0001>

<bundles_post_ra>
// kernel: tpu_custom_call.1
= control target key start
LH: loop header
LB: loop body
LE: loop exit
PB: predicated region body
PF: predicated region fallthrough
CT: control target
= control target key end

     0   :  { %12 = vsyncpa [#allocation4], 0  ;;  %s7281_s0 = inlined_call_operand.hbm [shape: bf16[16,768], index: 0, kind: input, shape index: {}]   ;;  %s7282_s1 = inlined_call_operand.hbm [shape: bf16[16,768], index: 1, kind: input, shape index: {}]   ;;  %s7283_s2 = inlined_call_operand.hbm [shape: bf16[768,768], index: 2, kind: input, shape index: {}]   ;;  %s7284_s3 = inlined_call_operand.hbm [shape: f32[1,768], index: 3, kind: input, shape index: {}]   ;;  %s7285_s4 = inlined_call_operand.hbm [shape: bf16[768,768], index: 4, kind: input, shape index: {}]   ;;  %s7286_s5 = inlined_call_operand.hbm [shape: f32[1,768], index: 5, kind: input, shape index: {}]   ;;  %s7287_s6 = inlined_call_operand.vmem [shape: f32[16,1], index: 6, kind: input, shape index: {}]   ;;  %s7288_s7 = inlined_call_operand.hbm [shape: f32[1,1], index: 7, kind: output, shape index: {}]  }
   0x1   :  { %14 = vsyncpa [#allocation4 + $0x1], 0 }
   0x2   :  { %15 = vsyncpa [#allocation7], 0 }
   0x3   :  { %17 = vsyncpa [#allocation7 + $0x1], 0 }
   0x4   :  { %18 = vsyncpa [#allocation10], 0 }
   0x5   :  { %19 = vsyncpa [#allocation13], 0 }
   0x6   :  { %20 = vsyncpa [#allocation5], 0  ;;  %s6855_s24 = smov 0   ;;  %s6857_s25 = smov 0  }
   0x7   :  { %s6859_s26 = smov 0   ;;  %s6861_s27 = smov 0  }
   0x8 LB: > { %s6805_s28 = smov [#allocation8]   ;;  %s6876_s30 = sadd.s32 4294967295, %s6803_s27   ;;  %s6803_s27 = sphi %s6861_s27, %s7310_s27   ;;  %s6799_s26 = sphi %s6859_s26, %s7309_s26   ;;  %s6795_s25 = sphi %s6857_s25, %s7308_s25   ;;  %s6791_s24 = sphi %s6855_s24, %s7307_s24  }
   0x9   : > { %s226_s29 = sshll.u32 %s6805_s28, 4  ;;  %p4910_p0 = scmp.ge.s32.totalorder %s6803_s27, 1  ;;  %s6881_s29 = int_to_ptr.vmem [resolvable:$true] %s226_s29 }
   0xa   : > { %p7289_p1 = scmp.eq.s32.totalorder %s6876_s30, 0  ;;  %p214_p2 = scmp.lt.s32.totalorder %s6803_s27, 3 }
   0xb   : > { %s6806_s9 = smov [#allocation9]   ;;  %s6807_s12 = smov [#allocation11]  }
   0xc   : > { %p6883_p3 = pnand %p4910_p0, %p214_p2  ;;  %s240_s10 = sshll.u32 %s6806_s9, 4  ;;  %s6895_s10 = int_to_ptr.vmem [resolvable:$true] %s240_s10 }
   0xd   : > { %s250_s13 = sshll.u32 %s6807_s12, 4  ;;  %s6565_s16 = scalar_lea.hbm %s7283_s2, 36864  ;;  %s6897_s13 = int_to_ptr.vmem [resolvable:$true] %s250_s13 }
   0xe   : > { %s7292_s8 = scalar_select %p6883_p3, 1, 0 }
   0xf   : > { %p5614_p4 = pneg %p6883_p3  ;;  %p6566_p6 = scmp.ne.s32.totalorder %s7283_s2, %s6565_s16 }
  0x10   : > { %p6572_p10 = scmp.lt.u32.totalorder %s6565_s16, %s7283_s2 }
  0x11   : > { %p6891_p5 = pnand %p5614_p4, %p7289_p1 }
  0x13   : > { %p6907_p7 = pneg %p6891_p5 }
  0x15   : > { %p6568_p8 = pnand %p6907_p7, %p6566_p6 }
  0x17   : > { %p6569_p9 = pneg %p6568_p8 }
  0x19   : > { %p6574_p11 = pnand %p6572_p10, %p6569_p9 }
  0x1b   : > { %6577 = shalt.err (!%p6574_p11)
}
  0x1c   : > { %s6578_s22 = scalar_lea.vmem %s6881_s29, 36864  ;;  %p6586_p2 = scmp.lt.s32.totalorder %s6881_s29, %s6881_s29 }
  0x1d   : > { %p6579_p12 = scmp.ne.s32.totalorder %s6881_s29, %s6578_s22  ;;  %p6587_p4 = scmp.lt.s32.totalorder %s6578_s22, %s6578_s22 }
  0x1f   : > { %p6581_p13 = pnand %p6579_p12, %p6907_p7  ;;  %p6588_p6 = por %p6587_p4, %p6586_p2 }
  0x21   : > { %p6582_p0 = pneg %p6581_p13 }
  0x23   : > { %p6589_p8 = pnand %p6588_p6, %p6582_p0 }
  0x25   : > { %6592 = shalt.err (!%p6589_p8)
}
  0x26   : > { %s6808_s23 = smov 384   ;;  %s6809_s28 = smov 24  }
  0x27   : > { %5617 = dma.hbm_to_vmem [thread:$0]  (!%p6891_p5), %s7283_s2, 36864, %s6881_s29, [#allocation7], %s6808_s23, %s6808_s23, %s6809_s28  }
  0x28   : > { %s6593_s16 = scalar_lea.hbm %s7284_s3, 96 }
  0x29   : > { %p6594_p9 = scmp.ne.s32.totalorder %s7284_s3, %s6593_s16  ;;  %p6600_p12 = scmp.lt.u32.totalorder %s6593_s16, %s7284_s3 }
  0x2b   : > { %p6596_p10 = pnand %p6594_p9, %p6907_p7 }
  0x2d   : > { %p6597_p11 = pneg %p6596_p10 }
  0x2f   : > { %p6602_p13 = pnand %p6600_p12, %p6597_p11 }
  0x31   : > { %6605 = shalt.err (!%p6602_p13)
}
  0x32   : > { %s6606_s29 = scalar_lea.vmem %s6895_s10, 96  ;;  %p6614_p6 = scmp.lt.s32.totalorder %s6895_s10, %s6895_s10 }
  0x33   : > { %p6607_p0 = scmp.ne.s32.totalorder %s6895_s10, %s6606_s29  ;;  %p6615_p8 = scmp.lt.s32.totalorder %s6606_s29, %s6606_s29 }
  0x35   : > { %p6609_p2 = pnand %p6607_p0, %p6907_p7  ;;  %p6616_p9 = por %p6615_p8, %p6614_p6 }
  0x37   : > { %p6610_p4 = pneg %p6609_p2 }
  0x39   : > { %p6617_p10 = pnand %p6616_p9, %p6610_p4 }
  0x3b   : > { %6620 = shalt.err (!%p6617_p10)
}
  0x3c   : > { %5620 = dma.hbm_to_vmem [thread:$0]  (!%p6891_p5), %s7284_s3, 96, %s6895_s10, [#allocation10]  }
  0x3d   : > { %s6621_s15 = scalar_lea.hbm %s7285_s4, 36864 }
  0x3e   : > { %p6622_p11 = scmp.ne.s32.totalorder %s7285_s4, %s6621_s15  ;;  %p6628_p0 = scmp.lt.u32.totalorder %s6621_s15, %s7285_s4 }
  0x40   : > { %p6624_p12 = pnand %p6622_p11, %p6907_p7 }
  0x42   : > { %p6625_p13 = pneg %p6624_p12 }
  0x44   : > { %p6630_p2 = pnand %p6628_p0, %p6625_p13 }
  0x46   : > { %6633 = shalt.err (!%p6630_p2)
}
  0x47   : > { %s6634_s10 = scalar_lea.vmem %s6897_s13, 36864  ;;  %p6642_p9 = scmp.lt.s32.totalorder %s6897_s13, %s6897_s13 }
  0x48   : > { %p6635_p4 = scmp.ne.s32.totalorder %s6897_s13, %s6634_s10  ;;  %p6643_p10 = scmp.lt.s32.totalorder %s6634_s10, %s6634_s10 }
  0x4a   : > { %p6637_p6 = pnand %p6635_p4, %p6907_p7  ;;  %p6644_p11 = por %p6643_p10, %p6642_p9 }
  0x4c   : > { %p6638_p8 = pneg %p6637_p6 }
  0x4e   : > { %p6645_p12 = pnand %p6644_p11, %p6638_p8 }
  0x50   : > { %6648 = shalt.err (!%p6645_p12)
}
  0x51   : > { %5623 = dma.hbm_to_vmem [thread:$0]  (!%p6891_p5), %s7285_s4, 36864, %s6897_s13, [#allocation10], %s6808_s23, %s6808_s23, %s6809_s28  }
  0x52   : > { %s6810_s22 = smov [#allocation12]   ;;  %s6649_s15 = scalar_lea.hbm %s7286_s5, 96 }
  0x53   : > { %s264_s9 = sshll.u32 %s6810_s22, 4  ;;  %p6650_p13 = scmp.ne.s32.totalorder %s7286_s5, %s6649_s15  ;;  %s265_s9 = int_to_ptr.vmem [resolvable:$true] %s264_s9 }
  0x54   : > { %p6656_p4 = scmp.lt.u32.totalorder %s6649_s15, %s7286_s5 }
  0x55   : > { %p6652_p0 = pnand %p6650_p13, %p6907_p7 }
  0x57   : > { %p6653_p2 = pneg %p6652_p0 }
  0x59   : > { %p6658_p6 = pnand %p6656_p4, %p6653_p2 }
  0x5b   : > { %6661 = shalt.err (!%p6658_p6)
}
  0x5c   : > { %s6662_s13 = scalar_lea.vmem %s265_s9, 96  ;;  %p6670_p11 = scmp.lt.s32.totalorder %s265_s9, %s265_s9 }
  0x5d   : > { %p6663_p8 = scmp.ne.s32.totalorder %s265_s9, %s6662_s13  ;;  %p6671_p12 = scmp.lt.s32.totalorder %s6662_s13, %s6662_s13 }
  0x5f   : > { %p6665_p9 = pnand %p6663_p8, %p6907_p7  ;;  %p6672_p1 = por %p6671_p12, %p6670_p11 }
  0x61   : > { %p6666_p10 = pneg %p6665_p9 }
  0x63   : > { %p6673_p3 = pnand %p6672_p1, %p6666_p10 }
  0x65   : > { %6676 = shalt.err (!%p6673_p3)
}
  0x66   : > { %5626 = dma.hbm_to_vmem [thread:$0]  (!%p6891_p5), %s7286_s5, 96, %s265_s9, [#allocation13]  }
  0x67   : > { %s6999_s19 = sadd.s32 1, %s6803_s27   ;;  %s33_s11 = sadd.s32 1, %s6799_s26 }
  0x68   : > { %s30_s10 = ssub.s32 %s6803_s27, %s6999_s19  ;;  %p40_p1 = scmp.ne.s32.totalorder %s6799_s26, %s6795_s25 }
  0x69   : > { %p31_p3 = scmp.eq.s32.totalorder %s30_s10, 0  ;;  %p41_p7 = scmp.eq.s32.totalorder %s6803_s27, 0 }
  0x6a   : > { %p46_p13 = scmp.ne.s32.totalorder %s6795_s25, %s6791_s24  ;;  %p5638_p0 = scmp.lt.s32.totalorder %s6803_s27, 2 }
  0x6b   : > { %s7011_s21 = scalar_select %p31_p3, %s6799_s26, %s33_s11  }
  0x6c   : > { %p42_p2 = por %p41_p7, %p40_p1  ;;  %p7295_p4 = scmp.eq.s32.totalorder %s6876_s30, 0 }
  0x6d   : > { %s275_s22 = sand.u32 1, %s6799_s26   ;;  %s5580_s9 = smul.u32 384, %s6803_s27 }
  0x6e   : > { %p7015_p6 = por %p7295_p4, %p46_p13  ;;  %s7021_s12 = smul.u32 24, %s275_s22 }
  0x6f   : > { %s7028_s16 = scalar_lea.hbm %s7281_s0, %s5580_s9  ;;  %p7030_p5 = pnand %p5638_p0, %p42_p2 }
  0x70   : > { %s7296_s29 = scalar_select %p7015_p6, 1, 0 }
  0x71   : > { %s294_s17 = sand.u32 1, %s6803_s27   ;;  %s279_s18 = scalar_lea.vmem [#allocation3], %s7021_s12 }
  0x72   : > { %s287_s20 = sshll.u32 %s279_s18, 4  ;;  %s276_s13 = scalar_lea.sflag [#allocation4], %s275_s22  ;;  %s7036_s20 = int_to_ptr.vmem [resolvable:$true] %s287_s20 }
  0x73   : > { %s6677_s23 = scalar_lea.hbm %s7028_s16, 384  ;;  %p6679_p9 = pneg %p7030_p5 }
  0x74   : > { %p6678_p8 = scmp.ne.s32.totalorder %s7028_s16, %s6677_s23  ;;  %s6682_s10 = scalar_lea.hbm %s7281_s0, 768 }
  0x75   : > { %p6683_p12 = scmp.lt.u32.totalorder %s7028_s16, %s7281_s0  ;;  %p6684_p1 = scmp.lt.u32.totalorder %s6682_s10, %s6677_s23 }
  0x76   : > { %p6680_p10 = pnand %p6679_p9, %p6678_p8  ;;  %p6686_p7 = scmp.lt.u32.totalorder %s6677_s23, %s7028_s16 }
  0x77   : > { %p6685_p3 = por %p6684_p1, %p6683_p12 }
  0x78   : > { %p6681_p11 = pneg %p6680_p10 }
  0x79   : > { %p6687_p13 = por %p6686_p7, %p6685_p3 }
  0x7b   : > { %p6688_p0 = pnand %p6687_p13, %p6681_p11 }
  0x7d   : > { %6691 = shalt.err (!%p6688_p0)
}
  0x7e   : > { %s6692_s22 = scalar_lea.vmem %s7036_s20, 384  ;;  %s6811_s18 = smov [#allocation3]  }
  0x7f   : > { %p6693_p2 = scmp.ne.s32.totalorder %s7036_s20, %s6692_s22  ;;  %s6697_s28 = sshll.u32 %s6811_s18, 4  ;;  %s6698_s28 = int_to_ptr.vmem [resolvable:$false] %s6697_s28 }
  0x80   : > { %s6699_s11 = scalar_lea.vmem %s6698_s28, 768  ;;  %p6700_p10 = scmp.lt.s32.totalorder %s7036_s20, %s6698_s28 }
  0x81   : > { %p6695_p4 = pnand %p6693_p2, %p6679_p9  ;;  %p6701_p12 = scmp.lt.s32.totalorder %s6699_s11, %s6692_s22 }
  0x83   : > { %p6696_p8 = pneg %p6695_p4  ;;  %p6702_p1 = por %p6701_p12, %p6700_p10 }
  0x85   : > { %p6703_p3 = pnand %p6702_p1, %p6696_p8 }
  0x87   : > { %6706 = shalt.err (!%p6703_p3)
}
  0x88   : > { %5630 = dma.hbm_to_vmem [thread:$0]  (!%p7030_p5), %s7028_s16, 384, %s7036_s20, %s276_s13  }
  0x89   : > { %s7068_s14 = scalar_lea.hbm %s7282_s1, %s5580_s9  ;;  %s298_s15 = scalar_lea.vmem [#allocation6], %s7021_s12 }
  0x8a   : > { %s306_s22 = sshll.u32 %s298_s15, 4  ;;  %s295_s18 = scalar_lea.sflag [#allocation7], %s294_s17  ;;  %s307_s22 = int_to_ptr.vmem [resolvable:$true] %s306_s22 }
  0x8b   : > { %s6707_s28 = scalar_lea.hbm %s7068_s14, 384  ;;  %s6712_s9 = scalar_lea.hbm %s7282_s1, 768 }
  0x8c   : > { %p6708_p11 = scmp.ne.s32.totalorder %s7068_s14, %s6707_s28  ;;  %p6713_p0 = scmp.lt.u32.totalorder %s7068_s14, %s7282_s1 }
  0x8d   : > { %p6714_p2 = scmp.lt.u32.totalorder %s6712_s9, %s6707_s28  ;;  %p6716_p8 = scmp.lt.u32.totalorder %s6707_s28, %s7068_s14 }
  0x8e   : > { %p6710_p7 = pnand %p6708_p11, %p6679_p9 }
  0x8f   : > { %p6715_p4 = por %p6714_p2, %p6713_p0 }
  0x90   : > { %p6711_p13 = pneg %p6710_p7 }
  0x91   : > { %p6717_p10 = por %p6716_p8, %p6715_p4 }
  0x93   : > { %p6718_p12 = pnand %p6717_p10, %p6711_p13 }
  0x95   : > { %6721 = shalt.err (!%p6718_p12)
}
  0x96   : > { %s6722_s27 = scalar_lea.vmem %s307_s22, 384  ;;  %s6812_s12 = smov [#allocation6]  }
  0x97   : > { %p6723_p1 = scmp.ne.s32.totalorder %s307_s22, %s6722_s27  ;;  %s6727_s17 = sshll.u32 %s6812_s12, 4  ;;  %s6728_s17 = int_to_ptr.vmem [resolvable:$false] %s6727_s17 }
  0x98   : > { %s6729_s23 = scalar_lea.vmem %s6728_s17, 768  ;;  %p6730_p7 = scmp.lt.s32.totalorder %s307_s22, %s6728_s17 }
  0x99   : > { %p6725_p3 = pnand %p6723_p1, %p6679_p9  ;;  %p6731_p6 = scmp.lt.s32.totalorder %s6729_s23, %s6722_s27 }
  0x9b   : > { %p6726_p11 = pneg %p6725_p3  ;;  %p6732_p0 = por %p6731_p6, %p6730_p7 }
  0x9d   : > { %p6733_p2 = pnand %p6732_p0, %p6726_p11 }
  0x9f   : > { %6736 = shalt.err (!%p6733_p2)
}
  0xa0   : > { %5633 = dma.hbm_to_vmem [thread:$0]  (!%p7030_p5), %s7068_s14, 384, %s307_s22, %s295_s18  }
  0xa1   : > { %p7298_p13 = scmp.ne.s32.totalorder %s7292_s8, 0 }
  0xa2   : > { %s324_s10 = sand.u32 (!%p7298_p13), 1, %s6795_s25   ;;  %p7299_p9 = scmp.ne.s32.totalorder (!%p7298_p13), %s7296_s29, 0 }
  0xa3   : > { %322 = sbr.rel (%p7298_p13) target bundleno = 1365 (0x555), region = 48  ;;  %s325_s28 = scalar_lea.sflag (!%p7298_p13), [#allocation4], %s324_s10 }
  0xa4   : > { %s5583_s15 = smul.u32 (!%p7298_p13), 24, %s324_s10 }
  0xa6   : > { %s7095_s16 = scalar_lea.vmem (!%p7298_p13), [#allocation3], %s5583_s15 }
  0xaa   : > { %6766 = dma.done.wait (%p7299_p9), %s325_s28, 384  }
  0xab   : > { %6768 = vsyncadd (%p7299_p9), %s325_s28, 4294966912  ;;  %s333_s24 = sand.u32 1, %s6876_s30   ;;  %s7102_s14 = scalar_lea.vmem [#allocation6], %s5583_s15 }
  0xac   : > { %s334_s20 = scalar_lea.sflag [#allocation7], %s333_s24 }
  0xad   : > { %6770 = dma.done.wait (%p7299_p9), %s334_s20, 384  }
  0xae   : > { %6772 = vsyncadd (%p7299_p9), %s334_s20, 4294966912  ;;  %p7300_p6 = scmp.eq.s32.totalorder %s6876_s30, 0 }
  0xb0   : > { %6774 = dma.done.wait (%p7300_p6), [#allocation7], 36864   ;;  %p7301_p5 = pmov %p7300_p6 }
  0xb2   : > { %6776 = vsyncadd (%p7301_p5), [#allocation7], 4294930432  ;;  %p7302_p4 = pmov %p7301_p5 }
  0xb4   : > { %6778 = dma.done.wait (%p7302_p4), [#allocation10], 36960   ;;  %p7303_p8 = pmov %p7302_p4 }
  0xb5   : > { %p7304_p10 = pmov %p7302_p4 }
  0xb6   : > { %6780 = vsyncadd (%p7303_p8), [#allocation10], 4294930336 }
  0xb7   : > { %6782 = dma.done.wait (%p7304_p10), [#allocation13], 96   ;;  %p7305_p12 = pmov %p7302_p4 }
  0xb8   : > { %v5687_v0 = vld [vmem:[#allocation8 + $0x4] ss:$24 sps:$4 sm:$0xff]   ;;  %v5691_v2 = vld [vmem:[#allocation8] ss:$24 sps:$4 sm:$0xff]   ;;  %v5693_v4 = vld [vmem:[#allocation8 + $0x34] ss:$24 sps:$4 sm:$0xff]   ;;  %p7306_p3 = pmov %p7302_p4 }
  0xb9   : > { %6784 = vsyncadd (%p7305_p12), [#allocation13], 4294967200  ;;  %v5689_v1 = vld [vmem:[#allocation8 + $0xc] ss:$24 sps:$4 sm:$0xff]   ;;  %2182 = vmatprep.subr.bf16.mxu0 %v5687_v0  ;;  %v5692_v3 = vld [vmem:[#allocation8 + $0x8] ss:$24 sps:$4 sm:$0xff]  }
  0xba   : > { %2305 = vmatprep.subr.bf16.mxu1 %v5689_v1  ;;  %2183 = vmatpush1.bf16.msra.mxu0 %v5691_v2  ;;  %v5695_v5 = vld [vmem:[#allocation8 + $0x3c] ss:$24 sps:$4 sm:$0xff]   ;;  %v5697_v6 = vld [vmem:[#allocation8 + $0x30] ss:$24 sps:$4 sm:$0xff]   ;;  %v5701_v9 = vld [vmem:[#allocation8 + $0x6c] ss:$24 sps:$4 sm:$0xff]  }
  0xbb   : > { %2306 = vmatpush1.bf16.msra.mxu1 %v5692_v3  ;;  %2184 = vmatprep.subr.bf16.mxu0 %v5693_v4  ;;  %v5698_v7 = vld [vmem:[#allocation8 + $0x38] ss:$24 sps:$4 sm:$0xff]   ;;  %v5699_v8 = vld [vmem:[#allocation8 + $0x64] ss:$24 sps:$4 sm:$0xff]   ;;  %v5704_v11 = vld [vmem:[#allocation8 + $0x68] ss:$24 sps:$4 sm:$0xff]  }
  0xbc   : > { %2307 = vmatprep.subr.bf16.mxu1 %v5695_v5  ;;  %v5703_v10 = vld [vmem:[#allocation8 + $0x60] ss:$24 sps:$4 sm:$0xff]   ;;  %v5705_v12 = vld [vmem:[#allocation8 + $0x94] ss:$24 sps:$4 sm:$0xff]   ;;  %v5709_v14 = vld [vmem:[#allocation8 + $0x90] ss:$24 sps:$4 sm:$0xff]  }
  0xbd   : > { %v5707_v13 = vld [vmem:[#allocation8 + $0x9c] ss:$24 sps:$4 sm:$0xff]   ;;  %v5710_v15 = vld [vmem:[#allocation8 + $0x98] ss:$24 sps:$4 sm:$0xff]   ;;  %v5713_v17 = vld [vmem:[#allocation8 + $0xcc] ss:$24 sps:$4 sm:$0xff]  }
  0xbe   : > { %2185 = vmatpush1.bf16.msra.mxu0 %v5697_v6  ;;  %v5711_v16 = vld [vmem:[#allocation8 + $0xc4] ss:$24 sps:$4 sm:$0xff]   ;;  %v5715_v18 = vld [vmem:[#allocation8 + $0xc0] ss:$24 sps:$4 sm:$0xff]   ;;  %v5717_v20 = vld [vmem:[#allocation8 + $0xf4] ss:$24 sps:$4 sm:$0xff]  }
  0xbf   : > { %2308 = vmatpush1.bf16.msra.mxu1 %v5698_v7  ;;  %2186 = vmatprep.subr.bf16.mxu0 %v5699_v8  ;;  %v5716_v19 = vld [vmem:[#allocation8 + $0xc8] ss:$24 sps:$4 sm:$0xff]   ;;  %v5719_v21 = vld [vmem:[#allocation8 + $0xfc] ss:$24 sps:$4 sm:$0xff]   ;;  %v5722_v23 = vld [vmem:[#allocation8 + $0xf8] ss:$24 sps:$4 sm:$0xff]  }
  0xc0   : > { %2309 = vmatprep.subr.bf16.mxu1 %v5701_v9  ;;  %v5721_v22 = vld [vmem:[#allocation8 + $0xf0] ss:$24 sps:$4 sm:$0xff]   ;;  %v5723_v24 = vld [vmem:[#allocation8 + $0x124] ss:$24 sps:$4 sm:$0xff]   ;;  %v5727_v26 = vld [vmem:[#allocation8 + $0x120] ss:$24 sps:$4 sm:$0xff]  }
  0xc1   : > { %v5725_v25 = vld [vmem:[#allocation8 + $0x12c] ss:$24 sps:$4 sm:$0xff]   ;;  %v5728_v27 = vld [vmem:[#allocation8 + $0x128] ss:$24 sps:$4 sm:$0xff]   ;;  %v5731_v29 = vld [vmem:[#allocation8 + $0x15c] ss:$24 sps:$4 sm:$0xff]  }
  0xc2   : > { %2187 = vmatpush1.bf16.msra.mxu0 %v5703_v10  ;;  %v5729_v28 = vld [vmem:[#allocation8 + $0x154] ss:$24 sps:$4 sm:$0xff]   ;;  %v5733_v30 = vld [vmem:[#allocation8 + $0x150] ss:$24 sps:$4 sm:$0xff]   ;;  %v5735_v32 = vld [vmem:[#allocation8 + $0x184] ss:$24 sps:$4 sm:$0xff]  }
  0xc3   : > { %2310 = vmatpush1.bf16.msra.mxu1 %v5704_v11  ;;  %2188 = vmatprep.subr.bf16.mxu0 %v5705_v12  ;;  %v5734_v31 = vld [vmem:[#allocation8 + $0x158] ss:$24 sps:$4 sm:$0xff]   ;;  %v5737_v33 = vld [vmem:[#allocation8 + $0x18c] ss:$24 sps:$4 sm:$0xff]   ;;  %v5740_v35 = vld [vmem:[#allocation8 + $0x188] ss:$24 sps:$4 sm:$0xff]  }
  0xc4   : > { %2311 = vmatprep.subr.bf16.mxu1 %v5707_v13  ;;  %v5739_v34 = vld [vmem:[#allocation8 + $0x180] ss:$24 sps:$4 sm:$0xff]   ;;  %v5741_v36 = vld [vmem:[#allocation8 + $0x1b4] ss:$24 sps:$4 sm:$0xff]   ;;  %v5745_v38 = vld [vmem:[#allocation8 + $0x1b0] ss:$24 sps:$4 sm:$0xff]  }
  0xc5   : > { %v5743_v37 = vld [vmem:[#allocation8 + $0x1bc] ss:$24 sps:$4 sm:$0xff]   ;;  %v5746_v39 = vld [vmem:[#allocation8 + $0x1b8] ss:$24 sps:$4 sm:$0xff]   ;;  %v5749_v41 = vld [vmem:[#allocation8 + $0x1ec] ss:$24 sps:$4 sm:$0xff]  }
  0xc6   : > { %2189 = vmatpush1.bf16.msra.mxu0 %v5709_v14  ;;  %v5747_v40 = vld [vmem:[#allocation8 + $0x1e4] ss:$24 sps:$4 sm:$0xff]   ;;  %v5751_v42 = vld [vmem:[#allocation8 + $0x1e0] ss:$24 sps:$4 sm:$0xff]   ;;  %v5753_v44 = vld [vmem:[#allocation8 + $0x214] ss:$24 sps:$4 sm:$0xff]  }
  0xc7   : > { %2312 = vmatpush1.bf16.msra.mxu1 %v5710_v15  ;;  %2190 = vmatprep.subr.bf16.mxu0 %v5711_v16  ;;  %v5752_v43 = vld [vmem:[#allocation8 + $0x1e8] ss:$24 sps:$4 sm:$0xff]   ;;  %v5755_v45 = vld [vmem:[#allocation8 + $0x21c] ss:$24 sps:$4 sm:$0xff]   ;;  %v5758_v49 = vld [vmem:[#allocation8 + $0x218] ss:$24 sps:$4 sm:$0xff]  }
  0xc8   : > { %2313 = vmatprep.subr.bf16.mxu1 %v5713_v17  ;;  %v398_v46 = vld [vmem:[%s7095_s16] sm:$0xff]  ;;  %v5757_v47 = vld [vmem:[#allocation8 + $0x210] ss:$24 sps:$4 sm:$0xff]   ;;  %v5765_v54 = vld [vmem:[#allocation8 + $0x274] ss:$24 sps:$4 sm:$0xff]   ;;  %p388_p1 = scmp.lt.s32.totalorder %s6876_s30, 1 }
  0xc9   : > { %v7121_v48 = vcombine.high %v398_v46, %v398_v46  ;;  %v5759_v50 = vld [vmem:[#allocation8 + $0x244] ss:$24 sps:$4 sm:$0xff]   ;;  %v5763_v52 = vld [vmem:[#allocation8 + $0x240] ss:$24 sps:$4 sm:$0xff]   ;;  %v5769_v56 = vld [vmem:[#allocation8 + $0x270] ss:$24 sps:$4 sm:$0xff]   ;;  %v7125_v5 = vcombine.low %v398_v46, %v398_v46 }
  0xca   : > { %2191 = vmatpush1.bf16.msra.mxu0 %v5715_v18  ;;  %v5761_v51 = vld [vmem:[#allocation8 + $0x24c] ss:$24 sps:$4 sm:$0xff]   ;;  %v5764_v53 = vld [vmem:[#allocation8 + $0x248] ss:$24 sps:$4 sm:$0xff]   ;;  %v5767_v55 = vld [vmem:[#allocation8 + $0x27c] ss:$24 sps:$4 sm:$0xff]  }
  0xcb   : > { %2314 = vmatpush1.bf16.msra.mxu1 %v5716_v19  ;;  %2192 = vmatprep.subr.bf16.mxu0 %v5717_v20  ;;  %v5770_v57 = vld [vmem:[#allocation8 + $0x278] ss:$24 sps:$4 sm:$0xff]   ;;  %v5771_v58 = vld [vmem:[#allocation8 + $0x2a4] ss:$24 sps:$4 sm:$0xff]   ;;  %v5776_v61 = vld [vmem:[#allocation8 + $0x2a8] ss:$24 sps:$4 sm:$0xff]  }
  0xcc   : > { %2315 = vmatprep.subr.bf16.mxu1 %v5719_v21  ;;  %2214 = vmatprep.mubr.bf16.mxu0 %v7121_v48  ;;  %v5773_v59 = vld [vmem:[#allocation8 + $0x2ac] ss:$24 sps:$4 sm:$0xff]   ;;  %v5775_v60 = vld [vmem:[#allocation8 + $0x2a0] ss:$24 sps:$4 sm:$0xff]   ;;  %v5779_v63 = vld [vmem:[#allocation8 + $0x2dc] ss:$24 sps:$4 sm:$0xff]  }
  0xcd   : > { %2337 = vmatprep.mubr.bf16.mxu1 %v7121_v48  ;;  %v5777_v62 = vld [vmem:[#allocation8 + $0x2d4] ss:$24 sps:$4 sm:$0xff]   ;;  %v5781_v0 = vld [vmem:[#allocation8 + $0x2d0] ss:$24 sps:$4 sm:$0xff]   ;;  %v5786_v2 = vld [vmem:[#allocation8 + $0x304] ss:$24 sps:$4 sm:$0xff]  }
  0xce   : > { %2193 = vmatpush1.bf16.msra.mxu0 %v5721_v22  ;;  %v5782_v1 = vld [vmem:[#allocation8 + $0x2d8] ss:$24 sps:$4 sm:$0xff]   ;;  %v5789_v3 = vld [vmem:[#allocation8 + $0x30c] ss:$24 sps:$4 sm:$0xff]   ;;  %v5787_v6 = vld [vmem:[#allocation8 + $0x308] ss:$24 sps:$4 sm:$0xff]  }
  0xcf   : > { %2316 = vmatpush1.bf16.msra.mxu1 %v5722_v23  ;;  %2194 = vmatprep.subr.bf16.mxu0 %v5723_v24  ;;  %v5784_v4 = vld [vmem:[#allocation8 + $0x300] ss:$24 sps:$4 sm:$0xff]   ;;  %v5793_v7 = vld [vmem:[#allocation8 + $0x334] ss:$24 sps:$4 sm:$0xff]   ;;  %v5791_v9 = vld [vmem:[#allocation8 + $0x330] ss:$24 sps:$4 sm:$0xff]  }
  0xd0   : > { %2317 = vmatprep.subr.bf16.mxu1 %v5725_v25  ;;  %v5796_v8 = vld [vmem:[#allocation8 + $0x33c] ss:$24 sps:$4 sm:$0xff]   ;;  %v5794_v10 = vld [vmem:[#allocation8 + $0x338] ss:$24 sps:$4 sm:$0xff]   ;;  %v5802_v12 = vld [vmem:[#allocation8 + $0x36c] ss:$24 sps:$4 sm:$0xff]  }
  0xd1   : > { %v5799_v11 = vld [vmem:[#allocation8 + $0x364] ss:$24 sps:$4 sm:$0xff]   ;;  %v5797_v13 = vld [vmem:[#allocation8 + $0x360] ss:$24 sps:$4 sm:$0xff]   ;;  %v5805_v15 = vld [vmem:[#allocation8 + $0x394] ss:$24 sps:$4 sm:$0xff]  }
  0xd2   : > { %2195 = vmatpush1.bf16.msra.mxu0 %v5727_v26  ;;  %v5800_v14 = vld [vmem:[#allocation8 + $0x368] ss:$24 sps:$4 sm:$0xff]   ;;  %v5808_v16 = vld [vmem:[#allocation8 + $0x39c] ss:$24 sps:$4 sm:$0xff]   ;;  %v5806_v18 = vld [vmem:[#allocation8 + $0x398] ss:$24 sps:$4 sm:$0xff]  }
  0xd3   : > { %2318 = vmatpush1.bf16.msra.mxu1 %v5728_v27  ;;  %2196 = vmatprep.subr.bf16.mxu0 %v5729_v28  ;;  %v5803_v17 = vld [vmem:[#allocation8 + $0x390] ss:$24 sps:$4 sm:$0xff]   ;;  %v5811_v19 = vld [vmem:[#allocation8 + $0x3c4] ss:$24 sps:$4 sm:$0xff]   ;;  %v5809_v21 = vld [vmem:[#allocation8 + $0x3c0] ss:$24 sps:$4 sm:$0xff]  }
  0xd4   : > { %2319 = vmatprep.subr.bf16.mxu1 %v5731_v29  ;;  %v5814_v20 = vld [vmem:[#allocation8 + $0x3cc] ss:$24 sps:$4 sm:$0xff]   ;;  %v5812_v22 = vld [vmem:[#allocation8 + $0x3c8] ss:$24 sps:$4 sm:$0xff]   ;;  %v5820_v24 = vld [vmem:[#allocation8 + $0x3fc] ss:$24 sps:$4 sm:$0xff]  }
  0xd5   : > { %v5817_v23 = vld [vmem:[#allocation8 + $0x3f4] ss:$24 sps:$4 sm:$0xff]   ;;  %v5815_v25 = vld [vmem:[#allocation8 + $0x3f0] ss:$24 sps:$4 sm:$0xff]   ;;  %v5823_v27 = vld [vmem:[#allocation8 + $0x424] ss:$24 sps:$4 sm:$0xff]  }
  0xd6   : > { %2197 = vmatpush1.bf16.msra.mxu0 %v5733_v30  ;;  %v5818_v26 = vld [vmem:[#allocation8 + $0x3f8] ss:$24 sps:$4 sm:$0xff]   ;;  %v5826_v28 = vld [vmem:[#allocation8 + $0x42c] ss:$24 sps:$4 sm:$0xff]   ;;  %s389_s8 = scalar_select %p388_p1, %s6876_s30, 1  ;;  %vm4758_vm1 = vcmask 7168  }
  0xd7   : > { %2320 = vmatpush1.bf16.msra.mxu1 %v5734_v31  ;;  %2198 = vmatprep.subr.bf16.mxu0 %v5735_v32  ;;  %v7130_v29 = vld [vmem:[%s7095_s16 + $0x8] sm:$0xff]  ;;  %s5513_s29 = sshll.u32 %s6876_s30, 3  ;;  %s6813_s11 = smov 0.0  }
  0xd8   : > { %2321 = vmatprep.subr.bf16.mxu1 %v5737_v33  ;;  %v7134_v30 = vcombine.high %v7130_v29, %v7130_v29  ;;  %v5821_v31 = vld [vmem:[#allocation8 + $0x420] ss:$24 sps:$4 sm:$0xff]   ;;  %v5829_v33 = vld [vmem:[#allocation8 + $0x454] ss:$24 sps:$4 sm:$0xff]   ;;  %s4923_s22 = sshll.u32 %s389_s8, 3  ;;  %5607 = sst [smem:[#allocation2]] (%p7306_p3), %s6813_s11 }
  0xd9   : > { %v5824_v32 = vld [vmem:[#allocation8 + $0x428] ss:$24 sps:$4 sm:$0xff]   ;;  %v5850_v46 = vld [vmem:[#allocation8 + $0x4ec] ss:$24 sps:$4 sm:$0xff]   ;;  %s391_s13 = scalar_lea.vmem %s7287_s6, %s4923_s22  ;;  %s4756_s27 = sld [smem:[#allocation2]] }
  0xda   : > { %2199 = vmatpush1.bf16.msra.mxu0 %v5739_v34  ;;  %v5832_v34 = vld [vmem:[#allocation8 + $0x45c] ss:$24 sps:$4 sm:$0xff]   ;;  %p5644_p11 = scmp.eq.s32.totalorder %s6876_s30, 1  ;;  %s6737_s28 = scalar_lea.hbm %s7288_s7, 16 }
  0xdb   : > { %2322 = vmatpush1.bf16.msra.mxu1 %v5740_v35  ;;  %2200 = vmatprep.subr.bf16.mxu0 %v5741_v36  ;;  %v5827_v35 = vld [vmem:[#allocation8 + $0x450] ss:$24 sps:$4 sm:$0xff]   ;;  %p6738_p7 = scmp.ne.s32.totalorder %s7288_s7, %s6737_s28  ;;  %p6743_p13 = scmp.lt.u32.totalorder %s6737_s28, %s7288_s7 }
  0xdc   : > { %2323 = vmatprep.subr.bf16.mxu1 %v5743_v37  ;;  %v5830_v36 = vld [vmem:[#allocation8 + $0x458] ss:$24 sps:$4 sm:$0xff]   ;;  %v5835_v37 = vld [vmem:[#allocation8 + $0x484] ss:$24 sps:$4 sm:$0xff]  }
  0xdd   : > { %p6739_p0 = pnand %p6738_p7, %p5644_p11 }
  0xde   : > { %2201 = vmatpush1.bf16.msra.mxu0 %v5745_v38  ;;  %v5838_v38 = vld [vmem:[#allocation8 + $0x48c] ss:$24 sps:$4 sm:$0xff]  }
  0xdf   : > { %2324 = vmatpush1.bf16.msra.mxu1 %v5746_v39  ;;  %2202 = vmatprep.subr.bf16.mxu0 %v5747_v40  ;;  %v5833_v39 = vld [vmem:[#allocation8 + $0x480] ss:$24 sps:$4 sm:$0xff]   ;;  %p6740_p2 = pneg %p6739_p0 }
  0xe0   : > { %2325 = vmatprep.subr.bf16.mxu1 %v5749_v41  ;;  %v5836_v40 = vld [vmem:[#allocation8 + $0x488] ss:$24 sps:$4 sm:$0xff]   ;;  %v5841_v41 = vld [vmem:[#allocation8 + $0x4b4] ss:$24 sps:$4 sm:$0xff]  }
  0xe1   : > { %p6745_p9 = pnand %p6743_p13, %p6740_p2 }
  0xe2   : > { %2203 = vmatpush1.bf16.msra.mxu0 %v5751_v42  ;;  %v5844_v42 = vld [vmem:[#allocation8 + $0x4bc] ss:$24 sps:$4 sm:$0xff]  }
  0xe3   : > { %2326 = vmatpush1.bf16.msra.mxu1 %v5752_v43  ;;  %2204 = vmatprep.subr.bf16.mxu0 %v5753_v44  ;;  %v5839_v43 = vld [vmem:[#allocation8 + $0x4b0] ss:$24 sps:$4 sm:$0xff]  }
  0xe4   : > { %2327 = vmatprep.subr.bf16.mxu1 %v5755_v45  ;;  %v5842_v44 = vld [vmem:[#allocation8 + $0x4b8] ss:$24 sps:$4 sm:$0xff]   ;;  %v5847_v45 = vld [vmem:[#allocation8 + $0x4e4] ss:$24 sps:$4 sm:$0xff]  }
  0xe6   : > { %2205 = vmatpush1.bf16.msra.mxu0 %v5757_v47  ;;  %v5845_v47 = vld [vmem:[#allocation8 + $0x4e0] ss:$24 sps:$4 sm:$0xff]  }
  0xe7   : > { %2328 = vmatpush1.bf16.msra.mxu1 %v5758_v49  ;;  %2206 = vmatprep.subr.bf16.mxu0 %v5759_v50  ;;  %v5848_v49 = vld [vmem:[#allocation8 + $0x4e8] ss:$24 sps:$4 sm:$0xff]   ;;  %v5853_v50 = vld [vmem:[#allocation8 + $0x514] ss:$24 sps:$4 sm:$0xff]  }
  0xe8   : > { %2329 = vmatprep.subr.bf16.mxu1 %v5761_v51  ;;  %v5856_v51 = vld [vmem:[#allocation8 + $0x51c] ss:$24 sps:$4 sm:$0xff]  }
  0xea   : > { %2207 = vmatpush1.bf16.msra.mxu0 %v5763_v52  ;;  %v5851_v52 = vld [vmem:[#allocation8 + $0x510] ss:$24 sps:$4 sm:$0xff]  }
  0xeb   : > { %2330 = vmatpush1.bf16.msra.mxu1 %v5764_v53  ;;  %2208 = vmatprep.subr.bf16.mxu0 %v5765_v54  ;;  %v5854_v53 = vld [vmem:[#allocation8 + $0x518] ss:$24 sps:$4 sm:$0xff]   ;;  %v5859_v54 = vld [vmem:[#allocation8 + $0x544] ss:$24 sps:$4 sm:$0xff]  }
  0xec   : > { %2331 = vmatprep.subr.bf16.mxu1 %v5767_v55  ;;  %v5862_v55 = vld [vmem:[#allocation8 + $0x54c] ss:$24 sps:$4 sm:$0xff]  }
  0xee   : > { %2209 = vmatpush1.bf16.msra.mxu0 %v5769_v56  ;;  %v5857_v56 = vld [vmem:[#allocation8 + $0x540] ss:$24 sps:$4 sm:$0xff]  }
  0xef   : > { %2332 = vmatpush1.bf16.msra.mxu1 %v5770_v57  ;;  %2210 = vmatprep.subr.bf16.mxu0 %v5771_v58  ;;  %v5860_v57 = vld [vmem:[#allocation8 + $0x548] ss:$24 sps:$4 sm:$0xff]   ;;  %v5865_v58 = vld [vmem:[#allocation8 + $0x574] ss:$24 sps:$4 sm:$0xff]  }
  0xf0   : > { %2333 = vmatprep.subr.bf16.mxu1 %v5773_v59  ;;  %v5868_v59 = vld [vmem:[#allocation8 + $0x57c] ss:$24 sps:$4 sm:$0xff]  }
  0xf2   : > { %2211 = vmatpush1.bf16.msra.mxu0 %v5775_v60  ;;  %v5863_v60 = vld [vmem:[#allocation8 + $0x570] ss:$24 sps:$4 sm:$0xff]  }
  0xf3   : > { %2334 = vmatpush1.bf16.msra.mxu1 %v5776_v61  ;;  %2212 = vmatprep.subr.bf16.mxu0 %v5777_v62  ;;  %v5866_v61 = vld [vmem:[#allocation8 + $0x578] ss:$24 sps:$4 sm:$0xff]   ;;  %v5871_v62 = vld [vmem:[#allocation8 + $0x5a4] ss:$24 sps:$4 sm:$0xff]  }
  0xf4   : > { %2335 = vmatprep.subr.bf16.mxu1 %v5779_v63  ;;  %v5874_v63 = vld [vmem:[#allocation8 + $0x5ac] ss:$24 sps:$4 sm:$0xff]  }
  0xf6   : > { %2213 = vmatpush1.bf16.msra.mxu0 %v5781_v0  ;;  %v5869_v0 = vld [vmem:[#allocation8 + $0x5a0] ss:$24 sps:$4 sm:$0xff]  }
  0xf7   : > { %2336 = vmatpush1.bf16.msra.mxu1 %v5782_v1  ;;  %2223 = vmatprep.subr.bf16.mxu0 %v5786_v2  ;;  %v5872_v1 = vld [vmem:[#allocation8 + $0x5a8] ss:$24 sps:$4 sm:$0xff]   ;;  %v5877_v2 = vld [vmem:[#allocation8 + $0x5d4] ss:$24 sps:$4 sm:$0xff]  }
  0xf8   : > { %2346 = vmatprep.subr.bf16.mxu1 %v5789_v3  ;;  %v5880_v3 = vld [vmem:[#allocation8 + $0x5dc] ss:$24 sps:$4 sm:$0xff]  }
  0xf9   : > { %2215 = vmatmul.mubr.bf16.vlgmr.msra.gmra.mrb[0].mxu0 %v7125_v5 }
  0xfa   : > { %2338 = vmatmul.mubr.bf16.vlgmr.msra.gmra.mrb[0].mxu1 %v7125_v5  ;;  %2224 = vmatpush1.bf16.msra.mxu0 %v5784_v4  ;;  %v5875_v4 = vld [vmem:[#allocation8 + $0x5d0] ss:$24 sps:$4 sm:$0xff]  }
  0xfb   : > { %2347 = vmatpush1.bf16.msra.mxu1 %v5787_v6  ;;  %2225 = vmatprep.subr.bf16.mxu0 %v5793_v7  ;;  %v5878_v6 = vld [vmem:[#allocation8 + $0x5d8] ss:$24 sps:$4 sm:$0xff]   ;;  %v5885_v7 = vld [vmem:[#allocation8 + $0x604] ss:$24 sps:$4 sm:$0xff]  }
  0xfc   : > { %2348 = vmatprep.subr.bf16.mxu1 %v5796_v8  ;;  %2255 = vmatprep.mubr.bf16.mxu0 %v7134_v30  ;;  %v5888_v8 = vld [vmem:[#allocation8 + $0x60c] ss:$24 sps:$4 sm:$0xff]  }
  0xfd   : > { %2378 = vmatprep.mubr.bf16.mxu1 %v7134_v30 }
  0xfe   : > { %2226 = vmatpush1.bf16.msra.mxu0 %v5791_v9  ;;  %v7140_v9 = vcombine.low %v7130_v29, %v7130_v29  ;;  %v5910_v29 = vld [vmem:[#allocation8 + $0x6c8] ss:$24 sps:$4 sm:$0xff]  }
  0xff   : > { %2349 = vmatpush1.bf16.msra.mxu1 %v5794_v10  ;;  %2227 = vmatprep.subr.bf16.mxu0 %v5799_v11  ;;  %v5883_v10 = vld [vmem:[#allocation8 + $0x600] ss:$24 sps:$4 sm:$0xff]  }
 0x100   : > { %2350 = vmatprep.subr.bf16.mxu1 %v5802_v12  ;;  %v5886_v11 = vld [vmem:[#allocation8 + $0x608] ss:$24 sps:$4 sm:$0xff]   ;;  %v5891_v12 = vld [vmem:[#allocation8 + $0x634] ss:$24 sps:$4 sm:$0xff]  }
 0x102   : > { %2228 = vmatpush1.bf16.msra.mxu0 %v5797_v13  ;;  %v7143_v13 = vld [vmem:[%s7095_s16 + $0x10] sm:$0xff] }
 0x103   : > { %2351 = vmatpush1.bf16.msra.mxu1 %v5800_v14  ;;  %2229 = vmatprep.subr.bf16.mxu0 %v5805_v15  ;;  %v5894_v14 = vld [vmem:[#allocation8 + $0x63c] ss:$24 sps:$4 sm:$0xff]   ;;  %v7147_v15 = vcombine.high %v7143_v13, %v7143_v13 }
 0x104   : > { %2352 = vmatprep.subr.bf16.mxu1 %v5808_v16  ;;  %v5889_v16 = vld [vmem:[#allocation8 + $0x630] ss:$24 sps:$4 sm:$0xff]  }
 0x106   : > { %2230 = vmatpush1.bf16.msra.mxu0 %v5803_v17  ;;  %v5892_v17 = vld [vmem:[#allocation8 + $0x638] ss:$24 sps:$4 sm:$0xff]  }
 0x107   : > { %2353 = vmatpush1.bf16.msra.mxu1 %v5806_v18  ;;  %2231 = vmatprep.subr.bf16.mxu0 %v5811_v19  ;;  %v5897_v18 = vld [vmem:[#allocation8 + $0x664] ss:$24 sps:$4 sm:$0xff]  }
 0x108   : > { %2354 = vmatprep.subr.bf16.mxu1 %v5814_v20  ;;  %v5900_v19 = vld [vmem:[#allocation8 + $0x66c] ss:$24 sps:$4 sm:$0xff]   ;;  %v5895_v20 = vld [vmem:[#allocation8 + $0x660] ss:$24 sps:$4 sm:$0xff]  }
 0x10a   : > { %2232 = vmatpush1.bf16.msra.mxu0 %v5809_v21  ;;  %v5898_v21 = vld [vmem:[#allocation8 + $0x668] ss:$24 sps:$4 sm:$0xff]  }
 0x10b   : > { %2355 = vmatpush1.bf16.msra.mxu1 %v5812_v22  ;;  %2233 = vmatprep.subr.bf16.mxu0 %v5817_v23  ;;  %v5903_v22 = vld [vmem:[#allocation8 + $0x694] ss:$24 sps:$4 sm:$0xff]  }
 0x10c   : > { %2356 = vmatprep.subr.bf16.mxu1 %v5820_v24  ;;  %v5906_v23 = vld [vmem:[#allocation8 + $0x69c] ss:$24 sps:$4 sm:$0xff]   ;;  %v5901_v24 = vld [vmem:[#allocation8 + $0x690] ss:$24 sps:$4 sm:$0xff]  }
 0x10e   : > { %2234 = vmatpush1.bf16.msra.mxu0 %v5815_v25  ;;  %v5904_v25 = vld [vmem:[#allocation8 + $0x698] ss:$24 sps:$4 sm:$0xff]  }
 0x10f   : > { %2357 = vmatpush1.bf16.msra.mxu1 %v5818_v26  ;;  %2235 = vmatprep.subr.bf16.mxu0 %v5823_v27  ;;  %v5909_v26 = vld [vmem:[#allocation8 + $0x6c4] ss:$24 sps:$4 sm:$0xff]  }
 0x110   : > { %2358 = vmatprep.subr.bf16.mxu1 %v5826_v28  ;;  %v5912_v27 = vld [vmem:[#allocation8 + $0x6cc] ss:$24 sps:$4 sm:$0xff]   ;;  %v5907_v28 = vld [vmem:[#allocation8 + $0x6c0] ss:$24 sps:$4 sm:$0xff]  }
 0x112   : > { %2236 = vmatpush1.bf16.msra.mxu0 %v5821_v31  ;;  %v5915_v31 = vld [vmem:[#allocation8 + $0x6f4] ss:$24 sps:$4 sm:$0xff]  }
 0x113   : > { %2359 = vmatpush1.bf16.msra.mxu1 %v5824_v32  ;;  %2237 = vmatprep.subr.bf16.mxu0 %v5829_v33  ;;  %v5918_v32 = vld [vmem:[#allocation8 + $0x6fc] ss:$24 sps:$4 sm:$0xff]   ;;  %v5913_v33 = vld [vmem:[#allocation8 + $0x6f0] ss:$24 sps:$4 sm:$0xff]  }
 0x114   : > { %2360 = vmatprep.subr.bf16.mxu1 %v5832_v34  ;;  %v5916_v34 = vld [vmem:[#allocation8 + $0x6f8] ss:$24 sps:$4 sm:$0xff]  }
 0x116   : > { %2238 = vmatpush1.bf16.msra.mxu0 %v5827_v35  ;;  %v5921_v35 = vld [vmem:[#allocation8 + $0x724] ss:$24 sps:$4 sm:$0xff]  }
 0x117   : > { %2361 = vmatpush1.bf16.msra.mxu1 %v5830_v36  ;;  %2239 = vmatprep.subr.bf16.mxu0 %v5835_v37  ;;  %v5924_v36 = vld [vmem:[#allocation8 + $0x72c] ss:$24 sps:$4 sm:$0xff]   ;;  %v5919_v37 = vld [vmem:[#allocation8 + $0x720] ss:$24 sps:$4 sm:$0xff]  }
 0x118   : > { %2362 = vmatprep.subr.bf16.mxu1 %v5838_v38  ;;  %v5922_v38 = vld [vmem:[#allocation8 + $0x728] ss:$24 sps:$4 sm:$0xff]  }
 0x11a   : > { %2240 = vmatpush1.bf16.msra.mxu0 %v5833_v39  ;;  %v5927_v39 = vld [vmem:[#allocation8 + $0x754] ss:$24 sps:$4 sm:$0xff]  }
 0x11b   : > { %2363 = vmatpush1.bf16.msra.mxu1 %v5836_v40  ;;  %2241 = vmatprep.subr.bf16.mxu0 %v5841_v41  ;;  %v5930_v40 = vld [vmem:[#allocation8 + $0x75c] ss:$24 sps:$4 sm:$0xff]   ;;  %v5925_v41 = vld [vmem:[#allocation8 + $0x750] ss:$24 sps:$4 sm:$0xff]  }
 0x11c   : > { %2364 = vmatprep.subr.bf16.mxu1 %v5844_v42  ;;  %v5928_v42 = vld [vmem:[#allocation8 + $0x758] ss:$24 sps:$4 sm:$0xff]  }
 0x11e   : > { %2242 = vmatpush1.bf16.msra.mxu0 %v5839_v43  ;;  %v5933_v43 = vld [vmem:[#allocation8 + $0x784] ss:$24 sps:$4 sm:$0xff]  }
 0x11f   : > { %2365 = vmatpush1.bf16.msra.mxu1 %v5842_v44  ;;  %2243 = vmatprep.subr.bf16.mxu0 %v5847_v45  ;;  %v5936_v44 = vld [vmem:[#allocation8 + $0x78c] ss:$24 sps:$4 sm:$0xff]   ;;  %v5931_v45 = vld [vmem:[#allocation8 + $0x780] ss:$24 sps:$4 sm:$0xff]  }
 0x120   : > { %2366 = vmatprep.subr.bf16.mxu1 %v5850_v46  ;;  %v5934_v46 = vld [vmem:[#allocation8 + $0x788] ss:$24 sps:$4 sm:$0xff]  }
 0x122   : > { %2244 = vmatpush1.bf16.msra.mxu0 %v5845_v47  ;;  %v5939_v47 = vld [vmem:[#allocation8 + $0x7b4] ss:$24 sps:$4 sm:$0xff]  }
 0x123   : > { %2367 = vmatpush1.bf16.msra.mxu1 %v5848_v49  ;;  %2245 = vmatprep.subr.bf16.mxu0 %v5853_v50  ;;  %v5942_v49 = vld [vmem:[#allocation8 + $0x7bc] ss:$24 sps:$4 sm:$0xff]   ;;  %v5937_v50 = vld [vmem:[#allocation8 + $0x7b0] ss:$24 sps:$4 sm:$0xff]  }
 0x124   : > { %2368 = vmatprep.subr.bf16.mxu1 %v5856_v51  ;;  %v5940_v51 = vld [vmem:[#allocation8 + $0x7b8] ss:$24 sps:$4 sm:$0xff]  }
 0x126   : > { %2246 = vmatpush1.bf16.msra.mxu0 %v5851_v52  ;;  %v5945_v52 = vld [vmem:[#allocation8 + $0x7e4] ss:$24 sps:$4 sm:$0xff]  }
 0x127   : > { %2369 = vmatpush1.bf16.msra.mxu1 %v5854_v53  ;;  %2247 = vmatprep.subr.bf16.mxu0 %v5859_v54  ;;  %v5948_v53 = vld [vmem:[#allocation8 + $0x7ec] ss:$24 sps:$4 sm:$0xff]   ;;  %v5943_v54 = vld [vmem:[#allocation8 + $0x7e0] ss:$24 sps:$4 sm:$0xff]  }
 0x128   : > { %2370 = vmatprep.subr.bf16.mxu1 %v5862_v55  ;;  %v5946_v55 = vld [vmem:[#allocation8 + $0x7e8] ss:$24 sps:$4 sm:$0xff]  }
 0x12a   : > { %2248 = vmatpush1.bf16.msra.mxu0 %v5857_v56  ;;  %v5951_v56 = vld [vmem:[#allocation8 + $0x814] ss:$24 sps:$4 sm:$0xff]  }
 0x12b   : > { %2371 = vmatpush1.bf16.msra.mxu1 %v5860_v57  ;;  %2249 = vmatprep.subr.bf16.mxu0 %v5865_v58  ;;  %v5954_v57 = vld [vmem:[#allocation8 + $0x81c] ss:$24 sps:$4 sm:$0xff]   ;;  %v5949_v58 = vld [vmem:[#allocation8 + $0x810] ss:$24 sps:$4 sm:$0xff]  }
 0x12c   : > { %2372 = vmatprep.subr.bf16.mxu1 %v5868_v59  ;;  %v5952_v59 = vld [vmem:[#allocation8 + $0x818] ss:$24 sps:$4 sm:$0xff]  }
 0x12e   : > { %2250 = vmatpush1.bf16.msra.mxu0 %v5863_v60  ;;  %v5957_v60 = vld [vmem:[#allocation8 + $0x844] ss:$24 sps:$4 sm:$0xff]  }
 0x12f   : > { %2373 = vmatpush1.bf16.msra.mxu1 %v5866_v61  ;;  %2251 = vmatprep.subr.bf16.mxu0 %v5871_v62  ;;  %v5960_v61 = vld [vmem:[#allocation8 + $0x84c] ss:$24 sps:$4 sm:$0xff]   ;;  %v5955_v62 = vld [vmem:[#allocation8 + $0x840] ss:$24 sps:$4 sm:$0xff]  }
 0x130   : > { %2374 = vmatprep.subr.bf16.mxu1 %v5874_v63  ;;  %v5958_v63 = vld [vmem:[#allocation8 + $0x848] ss:$24 sps:$4 sm:$0xff]  }
 0x132   : > { %2252 = vmatpush1.bf16.msra.mxu0 %v5869_v0  ;;  %v5963_v0 = vld [vmem:[#allocation8 + $0x874] ss:$24 sps:$4 sm:$0xff]  }
 0x133   : > { %2375 = vmatpush1.bf16.msra.mxu1 %v5872_v1  ;;  %2253 = vmatprep.subr.bf16.mxu0 %v5877_v2  ;;  %v5966_v1 = vld [vmem:[#allocation8 + $0x87c] ss:$24 sps:$4 sm:$0xff]   ;;  %v5961_v2 = vld [vmem:[#allocation8 + $0x870] ss:$24 sps:$4 sm:$0xff]  }
 0x134   : > { %2376 = vmatprep.subr.bf16.mxu1 %v5880_v3  ;;  %v5964_v3 = vld [vmem:[#allocation8 + $0x878] ss:$24 sps:$4 sm:$0xff]  }
 0x136   : > { %2254 = vmatpush1.bf16.msra.mxu0 %v5875_v4  ;;  %v5969_v4 = vld [vmem:[#allocation8 + $0x8a4] ss:$24 sps:$4 sm:$0xff]  }
 0x137   : > { %2377 = vmatpush1.bf16.msra.mxu1 %v5878_v6  ;;  %2264 = vmatprep.subr.bf16.mxu0 %v5885_v7  ;;  %v5972_v6 = vld [vmem:[#allocation8 + $0x8ac] ss:$24 sps:$4 sm:$0xff]   ;;  %v5967_v7 = vld [vmem:[#allocation8 + $0x8a0] ss:$24 sps:$4 sm:$0xff]  }
 0x138   : > { %2387 = vmatprep.subr.bf16.mxu1 %v5888_v8  ;;  %v5970_v8 = vld [vmem:[#allocation8 + $0x8a8] ss:$24 sps:$4 sm:$0xff]  }
 0x139   : > { %2256 = vmatmul.mubr.bf16.vlgmr.msra.gmra.mrb[0].mxu0 %v7140_v9 }
 0x13a   : > { %2379 = vmatmul.mubr.bf16.vlgmr.msra.gmra.mrb[0].mxu1 %v7140_v9  ;;  %2265 = vmatpush1.bf16.msra.mxu0 %v5883_v10  ;;  %v5975_v10 = vld [vmem:[#allocation8 + $0x8d4] ss:$24 sps:$4 sm:$0xff]  }
 0x13b   : > { %2388 = vmatpush1.bf16.msra.mxu1 %v5886_v11  ;;  %2266 = vmatprep.subr.bf16.mxu0 %v5891_v12  ;;  %v5978_v11 = vld [vmem:[#allocation8 + $0x8dc] ss:$24 sps:$4 sm:$0xff]   ;;  %v5973_v12 = vld [vmem:[#allocation8 + $0x8d0] ss:$24 sps:$4 sm:$0xff]  }
 0x13c   : > { %2389 = vmatprep.subr.bf16.mxu1 %v5894_v14  ;;  %2296 = vmatprep.mubr.bf16.mxu0 %v7147_v15  ;;  %v5976_v14 = vld [vmem:[#allocation8 + $0x8d8] ss:$24 sps:$4 sm:$0xff]  }
 0x13d   : > { %2419 = vmatprep.mubr.bf16.mxu1 %v7147_v15 }
 0x13e   : > { %2267 = vmatpush1.bf16.msra.mxu0 %v5889_v16  ;;  %v5983_v16 = vld [vmem:[#allocation8 + $0x14] ss:$24 sps:$4 sm:$0xff]  }
 0x13f   : > { %2390 = vmatpush1.bf16.msra.mxu1 %v5892_v17  ;;  %2268 = vmatprep.subr.bf16.mxu0 %v5897_v18  ;;  %v5986_v17 = vld [vmem:[#allocation11 + $0x4] ss:$24 sps:$4 sm:$0xff]  }
 0x140   : > { %2391 = vmatprep.subr.bf16.mxu1 %v5900_v19  ;;  %v5981_v18 = vld [vmem:[#allocation8 + $0x10] ss:$24 sps:$4 sm:$0xff]   ;;  %v7155_v19 = vcombine.low %v7143_v13, %v7143_v13 }
 0x141   : > { %v5990_v13 = vld [vmem:[#allocation11 + $0x30] ss:$24 sps:$4 sm:$0xff]  }
 0x142   : > { %2269 = vmatpush1.bf16.msra.mxu0 %v5895_v20  ;;  %v5984_v20 = vld [vmem:[#allocation11] ss:$24 sps:$4 sm:$0xff]  }
 0x143   : > { %2392 = vmatpush1.bf16.msra.mxu1 %v5898_v21  ;;  %2270 = vmatprep.subr.bf16.mxu0 %v5903_v22  ;;  %v7158_v21 = vld [vmem:[%s7102_s14] sm:$0xff]  ;;  %v5989_v22 = vld [vmem:[#allocation8 + $0x44] ss:$24 sps:$4 sm:$0xff]  }
 0x144   : > { %2393 = vmatprep.subr.bf16.mxu1 %v5906_v23  ;;  %v5992_v23 = vld [vmem:[#allocation11 + $0x34] ss:$24 sps:$4 sm:$0xff]  }
 0x146   : > { %2271 = vmatpush1.bf16.msra.mxu0 %v5901_v24  ;;  %v7162_v24 = vcombine.high %v7158_v21, %v7158_v21 }
 0x147   : > { %2394 = vmatpush1.bf16.msra.mxu1 %v5904_v25  ;;  %2272 = vmatprep.subr.bf16.mxu0 %v5909_v26  ;;  %v5987_v25 = vld [vmem:[#allocation8 + $0x40] ss:$24 sps:$4 sm:$0xff]   ;;  %v5995_v26 = vld [vmem:[#allocation8 + $0x74] ss:$24 sps:$4 sm:$0xff]  }
 0x148   : > { %2395 = vmatprep.subr.bf16.mxu1 %v5912_v27  ;;  %v5998_v27 = vld [vmem:[#allocation11 + $0x64] ss:$24 sps:$4 sm:$0xff]  }
 0x14a   : > { %2273 = vmatpush1.bf16.msra.mxu0 %v5907_v28  ;;  %v5993_v28 = vld [vmem:[#allocation8 + $0x70] ss:$24 sps:$4 sm:$0xff]  }
 0x14b   : > { %2396 = vmatpush1.bf16.msra.mxu1 %v5910_v29  ;;  %2274 = vmatprep.subr.bf16.mxu0 %v5915_v31  ;;  %v5996_v29 = vld [vmem:[#allocation11 + $0x60] ss:$24 sps:$4 sm:$0xff]  }
 0x14c   : > { %2397 = vmatprep.subr.bf16.mxu1 %v5918_v32  ;;  %v6001_v31 = vld [vmem:[#allocation8 + $0xa4] ss:$24 sps:$4 sm:$0xff]  }
 0x14d   : > { %v6004_v32 = vld [vmem:[#allocation11 + $0x94] ss:$24 sps:$4 sm:$0xff]  }
 0x14e   : > { %2275 = vmatpush1.bf16.msra.mxu0 %v5913_v33  ;;  %v5999_v33 = vld [vmem:[#allocation8 + $0xa0] ss:$24 sps:$4 sm:$0xff]  }
 0x14f   : > { %2398 = vmatpush1.bf16.msra.mxu1 %v5916_v34  ;;  %2276 = vmatprep.subr.bf16.mxu0 %v5921_v35  ;;  %v6002_v34 = vld [vmem:[#allocation11 + $0x90] ss:$24 sps:$4 sm:$0xff]  }
 0x150   : > { %2399 = vmatprep.subr.bf16.mxu1 %v5924_v36  ;;  %v6007_v35 = vld [vmem:[#allocation8 + $0xd4] ss:$24 sps:$4 sm:$0xff]  }
 0x151   : > { %v6010_v36 = vld [vmem:[#allocation11 + $0xc4] ss:$24 sps:$4 sm:$0xff]  }
 0x152   : > { %2277 = vmatpush1.bf16.msra.mxu0 %v5919_v37  ;;  %v6005_v37 = vld [vmem:[#allocation8 + $0xd0] ss:$24 sps:$4 sm:$0xff]  }
 0x153   : > { %2400 = vmatpush1.bf16.msra.mxu1 %v5922_v38  ;;  %2278 = vmatprep.subr.bf16.mxu0 %v5927_v39  ;;  %v6013_v38 = vld [vmem:[#allocation8 + $0x104] ss:$24 sps:$4 sm:$0xff]  }
 0x154   : > { %2401 = vmatprep.subr.bf16.mxu1 %v5930_v40  ;;  %v6016_v39 = vld [vmem:[#allocation11 + $0xf4] ss:$24 sps:$4 sm:$0xff]  }
 0x155   : > { %v6011_v40 = vld [vmem:[#allocation8 + $0x100] ss:$24 sps:$4 sm:$0xff]  }
 0x156   : > { %2279 = vmatpush1.bf16.msra.mxu0 %v5925_v41  ;;  %v6014_v41 = vld [vmem:[#allocation11 + $0xf0] ss:$24 sps:$4 sm:$0xff]  }
 0x157   : > { %2402 = vmatpush1.bf16.msra.mxu1 %v5928_v42  ;;  %2280 = vmatprep.subr.bf16.mxu0 %v5933_v43  ;;  %v6019_v42 = vld [vmem:[#allocation8 + $0x134] ss:$24 sps:$4 sm:$0xff]  }
 0x158   : > { %2403 = vmatprep.subr.bf16.mxu1 %v5936_v44  ;;  %v6022_v43 = vld [vmem:[#allocation11 + $0x124] ss:$24 sps:$4 sm:$0xff]  }
 0x159   : > { %v6017_v44 = vld [vmem:[#allocation8 + $0x130] ss:$24 sps:$4 sm:$0xff]  }
 0x15a   : > { %2281 = vmatpush1.bf16.msra.mxu0 %v5931_v45  ;;  %v6020_v45 = vld [vmem:[#allocation11 + $0x120] ss:$24 sps:$4 sm:$0xff]  }
 0x15b   : > { %2404 = vmatpush1.bf16.msra.mxu1 %v5934_v46  ;;  %2282 = vmatprep.subr.bf16.mxu0 %v5939_v47  ;;  %v6025_v46 = vld [vmem:[#allocation8 + $0x164] ss:$24 sps:$4 sm:$0xff]  }
 0x15c   : > { %2405 = vmatprep.subr.bf16.mxu1 %v5942_v49  ;;  %v6028_v47 = vld [vmem:[#allocation11 + $0x154] ss:$24 sps:$4 sm:$0xff]  }
 0x15d   : > { %v6023_v49 = vld [vmem:[#allocation8 + $0x160] ss:$24 sps:$4 sm:$0xff]  }
 0x15e   : > { %2283 = vmatpush1.bf16.msra.mxu0 %v5937_v50  ;;  %v6026_v50 = vld [vmem:[#allocation11 + $0x150] ss:$24 sps:$4 sm:$0xff]  }
 0x15f   : > { %2406 = vmatpush1.bf16.msra.mxu1 %v5940_v51  ;;  %2284 = vmatprep.subr.bf16.mxu0 %v5945_v52  ;;  %v6031_v51 = vld [vmem:[#allocation8 + $0x194] ss:$24 sps:$4 sm:$0xff]  }
 0x160   : > { %2407 = vmatprep.subr.bf16.mxu1 %v5948_v53  ;;  %v6034_v52 = vld [vmem:[#allocation11 + $0x184] ss:$24 sps:$4 sm:$0xff]  }
 0x161   : > { %v6029_v53 = vld [vmem:[#allocation8 + $0x190] ss:$24 sps:$4 sm:$0xff]  }
 0x162   : > { %2285 = vmatpush1.bf16.msra.mxu0 %v5943_v54  ;;  %v6032_v54 = vld [vmem:[#allocation11 + $0x180] ss:$24 sps:$4 sm:$0xff]  }
 0x163   : > { %2408 = vmatpush1.bf16.msra.mxu1 %v5946_v55  ;;  %2286 = vmatprep.subr.bf16.mxu0 %v5951_v56  ;;  %v6037_v55 = vld [vmem:[#allocation8 + $0x1c4] ss:$24 sps:$4 sm:$0xff]  }
 0x164   : > { %2409 = vmatprep.subr.bf16.mxu1 %v5954_v57  ;;  %v6040_v56 = vld [vmem:[#allocation11 + $0x1b4] ss:$24 sps:$4 sm:$0xff]  }
 0x165   : > { %v6035_v57 = vld [vmem:[#allocation8 + $0x1c0] ss:$24 sps:$4 sm:$0xff]  }
 0x166   : > { %2287 = vmatpush1.bf16.msra.mxu0 %v5949_v58  ;;  %v6038_v58 = vld [vmem:[#allocation11 + $0x1b0] ss:$24 sps:$4 sm:$0xff]  }
 0x167   : > { %2410 = vmatpush1.bf16.msra.mxu1 %v5952_v59  ;;  %2288 = vmatprep.subr.bf16.mxu0 %v5957_v60  ;;  %v6043_v59 = vld [vmem:[#allocation8 + $0x1f4] ss:$24 sps:$4 sm:$0xff]  }
 0x168   : > { %2411 = vmatprep.subr.bf16.mxu1 %v5960_v61  ;;  %v6046_v60 = vld [vmem:[#allocation11 + $0x1e4] ss:$24 sps:$4 sm:$0xff]  }
 0x169   : > { %v6041_v61 = vld [vmem:[#allocation8 + $0x1f0] ss:$24 sps:$4 sm:$0xff]  }
 0x16a   : > { %2289 = vmatpush1.bf16.msra.mxu0 %v5955_v62  ;;  %v6044_v62 = vld [vmem:[#allocation11 + $0x1e0] ss:$24 sps:$4 sm:$0xff]  }
 0x16b   : > { %2412 = vmatpush1.bf16.msra.mxu1 %v5958_v63  ;;  %2290 = vmatprep.subr.bf16.mxu0 %v5963_v0  ;;  %v6049_v63 = vld [vmem:[#allocation8 + $0x224] ss:$24 sps:$4 sm:$0xff]  }
 0x16c   : > { %2413 = vmatprep.subr.bf16.mxu1 %v5966_v1  ;;  %v6052_v0 = vld [vmem:[#allocation11 + $0x214] ss:$24 sps:$4 sm:$0xff]  }
 0x16d   : > { %v6047_v1 = vld [vmem:[#allocation8 + $0x220] ss:$24 sps:$4 sm:$0xff]  }
 0x16e   : > { %2291 = vmatpush1.bf16.msra.mxu0 %v5961_v2  ;;  %v6050_v2 = vld [vmem:[#allocation11 + $0x210] ss:$24 sps:$4 sm:$0xff]  }
 0x16f   : > { %2414 = vmatpush1.bf16.msra.mxu1 %v5964_v3  ;;  %2292 = vmatprep.subr.bf16.mxu0 %v5969_v4  ;;  %v6055_v3 = vld [vmem:[#allocation8 + $0x254] ss:$24 sps:$4 sm:$0xff]  }
 0x170   : > { %2415 = vmatprep.subr.bf16.mxu1 %v5972_v6  ;;  %v6058_v4 = vld [vmem:[#allocation11 + $0x244] ss:$24 sps:$4 sm:$0xff]  }
 0x171   : > { %v6053_v6 = vld [vmem:[#allocation8 + $0x250] ss:$24 sps:$4 sm:$0xff]  }
 0x172   : > { %2293 = vmatpush1.bf16.msra.mxu0 %v5967_v7  ;;  %v6056_v7 = vld [vmem:[#allocation11 + $0x240] ss:$24 sps:$4 sm:$0xff]  }
 0x173   : > { %2416 = vmatpush1.bf16.msra.mxu1 %v5970_v8  ;;  %2294 = vmatprep.subr.bf16.mxu0 %v5975_v10  ;;  %v6061_v8 = vld [vmem:[#allocation8 + $0x284] ss:$24 sps:$4 sm:$0xff]  }
 0x174   : > { %2417 = vmatprep.subr.bf16.mxu1 %v5978_v11  ;;  %v6064_v10 = vld [vmem:[#allocation11 + $0x274] ss:$24 sps:$4 sm:$0xff]  }
 0x175   : > { %v6059_v11 = vld [vmem:[#allocation8 + $0x280] ss:$24 sps:$4 sm:$0xff]  }
 0x176   : > { %2295 = vmatpush1.bf16.msra.mxu0 %v5973_v12  ;;  %v6062_v12 = vld [vmem:[#allocation11 + $0x270] ss:$24 sps:$4 sm:$0xff]  }
 0x177   : > { %2418 = vmatpush1.bf16.msra.mxu1 %v5976_v14  ;;  %2428 = vmatprep.subr.bf16.mxu0 %v5983_v16  ;;  %v6067_v14 = vld [vmem:[#allocation8 + $0x2b4] ss:$24 sps:$4 sm:$0xff]  }
 0x178   : > { %4335 = vmatprep.subr.bf16.mxu1 %v5986_v17  ;;  %v6070_v16 = vld [vmem:[#allocation11 + $0x2a4] ss:$24 sps:$4 sm:$0xff]  }
 0x179   : > { %2297 = vmatmul.mubr.bf16.vlgmr.msra.gmra.mrb[0].mxu0 %v7155_v19  ;;  %v6065_v17 = vld [vmem:[#allocation8 + $0x2b0] ss:$24 sps:$4 sm:$0xff]  }
 0x17a   : > { %2420 = vmatmul.mubr.bf16.vlgmr.msra.gmra.mrb[0].mxu1 %v7155_v19  ;;  %2429 = vmatpush1.bf16.msra.mxu0 %v5981_v18  ;;  %v6068_v18 = vld [vmem:[#allocation11 + $0x2a0] ss:$24 sps:$4 sm:$0xff]  }
 0x17b   : > { %4336 = vmatpush1.bf16.msra.mxu1 %v5984_v20  ;;  %2430 = vmatprep.subr.bf16.mxu0 %v5989_v22  ;;  %v6073_v20 = vld [vmem:[#allocation8 + $0x2e4] ss:$24 sps:$4 sm:$0xff]  }
 0x17c   : > { %4337 = vmatprep.subr.bf16.mxu1 %v5992_v23  ;;  %2460 = vmatprep.mubr.bf16.mxu0 %v7121_v48  ;;  %v6008_v48 = vld [vmem:[#allocation11 + $0xc0] ss:$24 sps:$4 sm:$0xff]   ;;  %v6076_v22 = vld [vmem:[#allocation11 + $0x2d4] ss:$24 sps:$4 sm:$0xff]  }
 0x17d   : > { %4367 = vmatprep.mubr.bf16.mxu1 %v7162_v24  ;;  %v6071_v23 = vld [vmem:[#allocation8 + $0x2e0] ss:$24 sps:$4 sm:$0xff]  }
 0x17e   : > { %2431 = vmatpush1.bf16.msra.mxu0 %v5987_v25  ;;  %v6074_v25 = vld [vmem:[#allocation11 + $0x2d0] ss:$24 sps:$4 sm:$0xff]  }
 0x17f   : > { %4338 = vmatpush1.bf16.msra.mxu1 %v5990_v13  ;;  %2432 = vmatprep.subr.bf16.mxu0 %v5995_v26  ;;  %v6079_v13 = vld [vmem:[#allocation8 + $0x314] ss:$24 sps:$4 sm:$0xff]  }
 0x180   : > { %4339 = vmatprep.subr.bf16.mxu1 %v5998_v27  ;;  %v6084_v26 = vld [vmem:[#allocation11 + $0x304] ss:$24 sps:$4 sm:$0xff]  }
 0x181   : > { %v6077_v27 = vld [vmem:[#allocation8 + $0x310] ss:$24 sps:$4 sm:$0xff]  }
 0x182   : > { %2433 = vmatpush1.bf16.msra.mxu0 %v5993_v28  ;;  %v7170_v28 = vcombine.low %v7158_v21, %v7158_v21  ;;  %v6085_v21 = vld [vmem:[#allocation8 + $0x340] ss:$24 sps:$4 sm:$0xff]  }
 0x183   : > { %4340 = vmatpush1.bf16.msra.mxu1 %v5996_v29  ;;  %2434 = vmatprep.subr.bf16.mxu0 %v6001_v31  ;;  %v7173_v29 = vld [vmem:[%s7102_s14 + $0x8] sm:$0xff] }
 0x184   : > { %4341 = vmatprep.subr.bf16.mxu1 %v6004_v32  ;;  %v6082_v31 = vld [vmem:[#allocation11 + $0x300] ss:$24 sps:$4 sm:$0xff]  }
 0x185   : > { %v6087_v32 = vld [vmem:[#allocation8 + $0x344] ss:$24 sps:$4 sm:$0xff]  }
 0x186   : > { %2435 = vmatpush1.bf16.msra.mxu0 %v5999_v33  ;;  %v6090_v33 = vld [vmem:[#allocation11 + $0x334] ss:$24 sps:$4 sm:$0xff]  }
 0x187   : > { %4342 = vmatpush1.bf16.msra.mxu1 %v6002_v34  ;;  %2436 = vmatprep.subr.bf16.mxu0 %v6007_v35  ;;  %v7177_v34 = vcombine.high %v7173_v29, %v7173_v29  ;;  %v6088_v35 = vld [vmem:[#allocation11 + $0x330] ss:$24 sps:$4 sm:$0xff]  }
 0x188   : > { %4343 = vmatprep.subr.bf16.mxu1 %v6010_v36  ;;  %v6093_v36 = vld [vmem:[#allocation8 + $0x374] ss:$24 sps:$4 sm:$0xff]  }
 0x18a   : > { %2437 = vmatpush1.bf16.msra.mxu0 %v6005_v37  ;;  %v6096_v37 = vld [vmem:[#allocation11 + $0x364] ss:$24 sps:$4 sm:$0xff]  }
 0x18b   : > { %4344 = vmatpush1.bf16.msra.mxu1 %v6008_v48  ;;  %2438 = vmatprep.subr.bf16.mxu0 %v6013_v38  ;;  %v6091_v48 = vld [vmem:[#allocation8 + $0x370] ss:$24 sps:$4 sm:$0xff]  }
 0x18c   : > { %4345 = vmatprep.subr.bf16.mxu1 %v6016_v39  ;;  %v6094_v38 = vld [vmem:[#allocation11 + $0x360] ss:$24 sps:$4 sm:$0xff]   ;;  %v6102_v39 = vld [vmem:[#allocation11 + $0x394] ss:$24 sps:$4 sm:$0xff]  }
 0x18e   : > { %2439 = vmatpush1.bf16.msra.mxu0 %v6011_v40  ;;  %v6097_v40 = vld [vmem:[#allocation8 + $0x3a0] ss:$24 sps:$4 sm:$0xff]  }
 0x18f   : > { %4346 = vmatpush1.bf16.msra.mxu1 %v6014_v41  ;;  %2440 = vmatprep.subr.bf16.mxu0 %v6019_v42  ;;  %v6100_v41 = vld [vmem:[#allocation11 + $0x390] ss:$24 sps:$4 sm:$0xff]  }
 0x190   : > { %4347 = vmatprep.subr.bf16.mxu1 %v6022_v43  ;;  %v6105_v42 = vld [vmem:[#allocation8 + $0x3d4] ss:$24 sps:$4 sm:$0xff]  }
 0x191   : > { %v6108_v43 = vld [vmem:[#allocation11 + $0x3c4] ss:$24 sps:$4 sm:$0xff]  }
 0x192   : > { %2441 = vmatpush1.bf16.msra.mxu0 %v6017_v44  ;;  %v6106_v44 = vld [vmem:[#allocation11 + $0x3c0] ss:$24 sps:$4 sm:$0xff]  }
 0x193   : > { %4348 = vmatpush1.bf16.msra.mxu1 %v6020_v45  ;;  %2442 = vmatprep.subr.bf16.mxu0 %v6025_v46  ;;  %v6111_v45 = vld [vmem:[#allocation8 + $0x404] ss:$24 sps:$4 sm:$0xff]  }
 0x194   : > { %4349 = vmatprep.subr.bf16.mxu1 %v6028_v47  ;;  %v6114_v46 = vld [vmem:[#allocation11 + $0x3f4] ss:$24 sps:$4 sm:$0xff]  }
 0x195   : > { %v6109_v47 = vld [vmem:[#allocation8 + $0x400] ss:$24 sps:$4 sm:$0xff]  }
 0x196   : > { %2443 = vmatpush1.bf16.msra.mxu0 %v6023_v49  ;;  %v6112_v49 = vld [vmem:[#allocation11 + $0x3f0] ss:$24 sps:$4 sm:$0xff]  }
 0x197   : > { %4350 = vmatpush1.bf16.msra.mxu1 %v6026_v50  ;;  %2444 = vmatprep.subr.bf16.mxu0 %v6031_v51  ;;  %v6117_v50 = vld [vmem:[#allocation8 + $0x434] ss:$24 sps:$4 sm:$0xff]  }
 0x198   : > { %4351 = vmatprep.subr.bf16.mxu1 %v6034_v52  ;;  %v6120_v51 = vld [vmem:[#allocation11 + $0x424] ss:$24 sps:$4 sm:$0xff]  }
 0x199   : > { %v6115_v52 = vld [vmem:[#allocation8 + $0x430] ss:$24 sps:$4 sm:$0xff]  }
 0x19a   : > { %2445 = vmatpush1.bf16.msra.mxu0 %v6029_v53  ;;  %v6118_v53 = vld [vmem:[#allocation11 + $0x420] ss:$24 sps:$4 sm:$0xff]  }
 0x19b   : > { %4352 = vmatpush1.bf16.msra.mxu1 %v6032_v54  ;;  %2446 = vmatprep.subr.bf16.mxu0 %v6037_v55  ;;  %v6123_v54 = vld [vmem:[#allocation8 + $0x464] ss:$24 sps:$4 sm:$0xff]  }
 0x19c   : > { %4353 = vmatprep.subr.bf16.mxu1 %v6040_v56  ;;  %v6126_v55 = vld [vmem:[#allocation11 + $0x454] ss:$24 sps:$4 sm:$0xff]  }
 0x19d   : > { %v6121_v56 = vld [vmem:[#allocation8 + $0x460] ss:$24 sps:$4 sm:$0xff]  }
 0x19e   : > { %2447 = vmatpush1.bf16.msra.mxu0 %v6035_v57  ;;  %v6124_v57 = vld [vmem:[#allocation11 + $0x450] ss:$24 sps:$4 sm:$0xff]  }
 0x19f   : > { %4354 = vmatpush1.bf16.msra.mxu1 %v6038_v58  ;;  %2448 = vmatprep.subr.bf16.mxu0 %v6043_v59  ;;  %v6129_v58 = vld [vmem:[#allocation8 + $0x494] ss:$24 sps:$4 sm:$0xff]  }
 0x1a0   : > { %4355 = vmatprep.subr.bf16.mxu1 %v6046_v60  ;;  %v6132_v59 = vld [vmem:[#allocation11 + $0x484] ss:$24 sps:$4 sm:$0xff]  }
 0x1a1   : > { %v6127_v60 = vld [vmem:[#allocation8 + $0x490] ss:$24 sps:$4 sm:$0xff]  }
 0x1a2   : > { %2449 = vmatpush1.bf16.msra.mxu0 %v6041_v61  ;;  %v6130_v61 = vld [vmem:[#allocation11 + $0x480] ss:$24 sps:$4 sm:$0xff]  }
 0x1a3   : > { %4356 = vmatpush1.bf16.msra.mxu1 %v6044_v62  ;;  %2450 = vmatprep.subr.bf16.mxu0 %v6049_v63  ;;  %v6135_v62 = vld [vmem:[#allocation8 + $0x4c4] ss:$24 sps:$4 sm:$0xff]  }
 0x1a4   : > { %4357 = vmatprep.subr.bf16.mxu1 %v6052_v0  ;;  %v6138_v63 = vld [vmem:[#allocation11 + $0x4b4] ss:$24 sps:$4 sm:$0xff]  }
 0x1a5   : > { %v6133_v0 = vld [vmem:[#allocation8 + $0x4c0] ss:$24 sps:$4 sm:$0xff]  }
 0x1a6   : > { %2451 = vmatpush1.bf16.msra.mxu0 %v6047_v1  ;;  %v6136_v1 = vld [vmem:[#allocation11 + $0x4b0] ss:$24 sps:$4 sm:$0xff]  }
 0x1a7   : > { %4358 = vmatpush1.bf16.msra.mxu1 %v6050_v2  ;;  %2452 = vmatprep.subr.bf16.mxu0 %v6055_v3  ;;  %v6141_v2 = vld [vmem:[#allocation8 + $0x4f4] ss:$24 sps:$4 sm:$0xff]  }
 0x1a8   : > { %4359 = vmatprep.subr.bf16.mxu1 %v6058_v4  ;;  %v6144_v3 = vld [vmem:[#allocation11 + $0x4e4] ss:$24 sps:$4 sm:$0xff]  }
 0x1a9   : > { %v6139_v4 = vld [vmem:[#allocation8 + $0x4f0] ss:$24 sps:$4 sm:$0xff]  }
 0x1aa   : > { %2453 = vmatpush1.bf16.msra.mxu0 %v6053_v6  ;;  %v6142_v6 = vld [vmem:[#allocation11 + $0x4e0] ss:$24 sps:$4 sm:$0xff]  }
 0x1ab   : > { %4360 = vmatpush1.bf16.msra.mxu1 %v6056_v7  ;;  %2454 = vmatprep.subr.bf16.mxu0 %v6061_v8  ;;  %v6147_v7 = vld [vmem:[#allocation8 + $0x524] ss:$24 sps:$4 sm:$0xff]  }
 0x1ac   : > { %4361 = vmatprep.subr.bf16.mxu1 %v6064_v10  ;;  %v6150_v8 = vld [vmem:[#allocation11 + $0x514] ss:$24 sps:$4 sm:$0xff]  }
 0x1ad   : > { %v6145_v10 = vld [vmem:[#allocation8 + $0x520] ss:$24 sps:$4 sm:$0xff]  }
 0x1ae   : > { %2455 = vmatpush1.bf16.msra.mxu0 %v6059_v11  ;;  %v6148_v11 = vld [vmem:[#allocation11 + $0x510] ss:$24 sps:$4 sm:$0xff]  }
 0x1af   : > { %4362 = vmatpush1.bf16.msra.mxu1 %v6062_v12  ;;  %2456 = vmatprep.subr.bf16.mxu0 %v6067_v14  ;;  %v6153_v12 = vld [vmem:[#allocation8 + $0x554] ss:$24 sps:$4 sm:$0xff]  }
 0x1b0   : > { %4363 = vmatprep.subr.bf16.mxu1 %v6070_v16  ;;  %v6156_v14 = vld [vmem:[#allocation11 + $0x544] ss:$24 sps:$4 sm:$0xff]  }
 0x1b1   : > { %v6151_v16 = vld [vmem:[#allocation8 + $0x550] ss:$24 sps:$4 sm:$0xff]  }
 0x1b2   : > { %2457 = vmatpush1.bf16.msra.mxu0 %v6065_v17  ;;  %v6154_v17 = vld [vmem:[#allocation11 + $0x540] ss:$24 sps:$4 sm:$0xff]  }
 0x1b3   : > { %4364 = vmatpush1.bf16.msra.mxu1 %v6068_v18  ;;  %2458 = vmatprep.subr.bf16.mxu0 %v6073_v20  ;;  %v6159_v18 = vld [vmem:[#allocation8 + $0x584] ss:$24 sps:$4 sm:$0xff]  }
 0x1b4   : > { %4365 = vmatprep.subr.bf16.mxu1 %v6076_v22  ;;  %v6162_v20 = vld [vmem:[#allocation11 + $0x574] ss:$24 sps:$4 sm:$0xff]  }
 0x1b5   : > { %v6157_v22 = vld [vmem:[#allocation8 + $0x580] ss:$24 sps:$4 sm:$0xff]  }
 0x1b6   : > { %2459 = vmatpush1.bf16.msra.mxu0 %v6071_v23  ;;  %v6160_v23 = vld [vmem:[#allocation11 + $0x570] ss:$24 sps:$4 sm:$0xff]  }
 0x1b7   : > { %4366 = vmatpush1.bf16.msra.mxu1 %v6074_v25  ;;  %2469 = vmatprep.subr.bf16.mxu0 %v6079_v13  ;;  %v6165_v25 = vld [vmem:[#allocation8 + $0x5b4] ss:$24 sps:$4 sm:$0xff]  }
 0x1b8   : > { %4376 = vmatprep.subr.bf16.mxu1 %v6084_v26  ;;  %v6168_v13 = vld [vmem:[#allocation11 + $0x5a4] ss:$24 sps:$4 sm:$0xff]  }
 0x1b9   : > { %2461 = vmatmul.mubr.bf16.vlgmr.msra.gmra.mrb[4].mxu0 %v7125_v5  ;;  %v6099_v5 = vld [vmem:[#allocation8 + $0x3a4] ss:$24 sps:$4 sm:$0xff]   ;;  %v6163_v26 = vld [vmem:[#allocation8 + $0x5b0] ss:$24 sps:$4 sm:$0xff]  }
 0x1ba   : > { %4368 = vmatmul.mubr.bf16.vlgmr.msra.gmra.mrb[4].mxu1 %v7170_v28  ;;  %2470 = vmatpush1.bf16.msra.mxu0 %v6077_v27  ;;  %v6166_v27 = vld [vmem:[#allocation11 + $0x5a0] ss:$24 sps:$4 sm:$0xff]  }
 0x1bb   : > { %4377 = vmatpush1.bf16.msra.mxu1 %v6082_v31  ;;  %2471 = vmatprep.subr.bf16.mxu0 %v6087_v32  ;;  %v6171_v31 = vld [vmem:[#allocation8 + $0x5e4] ss:$24 sps:$4 sm:$0xff]  }
 0x1bc   : > { %4378 = vmatprep.subr.bf16.mxu1 %v6090_v33  ;;  %2501 = vmatprep.mubr.bf16.mxu0 %v7134_v30  ;;  %v6103_v30 = vld [vmem:[#allocation8 + $0x3d0] ss:$24 sps:$4 sm:$0xff]   ;;  %v6169_v33 = vld [vmem:[#allocation8 + $0x5e0] ss:$24 sps:$4 sm:$0xff]  }
 0x1bd   : > { %4408 = vmatprep.mubr.bf16.mxu1 %v7177_v34  ;;  %v6174_v32 = vld [vmem:[#allocation11 + $0x5d4] ss:$24 sps:$4 sm:$0xff]  }
 0x1be   : > { %2472 = vmatpush1.bf16.msra.mxu0 %v6085_v21  ;;  %v6172_v21 = vld [vmem:[#allocation11 + $0x5d0] ss:$24 sps:$4 sm:$0xff]  }
 0x1bf   : > { %4379 = vmatpush1.bf16.msra.mxu1 %v6088_v35  ;;  %2473 = vmatprep.subr.bf16.mxu0 %v6093_v36  ;;  %v6177_v35 = vld [vmem:[#allocation8 + $0x614] ss:$24 sps:$4 sm:$0xff]  }
 0x1c0   : > { %4380 = vmatprep.subr.bf16.mxu1 %v6096_v37  ;;  %v6182_v36 = vld [vmem:[#allocation11 + $0x604] ss:$24 sps:$4 sm:$0xff]  }
 0x1c1   : > { %v7184_v37 = vld [vmem:[%s7102_s14 + $0x10] sm:$0xff] }
 0x1c2   : > { %2474 = vmatpush1.bf16.msra.mxu0 %v6091_v48  ;;  %v7188_v48 = vcombine.low %v7173_v29, %v7173_v29  ;;  %v6183_v29 = vld [vmem:[#allocation8 + $0x640] ss:$24 sps:$4 sm:$0xff]  }
 0x1c3   : > { %4381 = vmatpush1.bf16.msra.mxu1 %v6094_v38  ;;  %2475 = vmatprep.subr.bf16.mxu0 %v6099_v5  ;;  %v6175_v38 = vld [vmem:[#allocation8 + $0x610] ss:$24 sps:$4 sm:$0xff]  }
 0x1c4   : > { %4382 = vmatprep.subr.bf16.mxu1 %v6102_v39  ;;  %v6180_v5 = vld [vmem:[#allocation11 + $0x600] ss:$24 sps:$4 sm:$0xff]  }
 0x1c5   : > { %v6185_v39 = vld [vmem:[#allocation8 + $0x644] ss:$24 sps:$4 sm:$0xff]  }
 0x1c6   : > { %2476 = vmatpush1.bf16.msra.mxu0 %v6097_v40  ;;  %v6188_v40 = vld [vmem:[#allocation11 + $0x634] ss:$24 sps:$4 sm:$0xff]  }
 0x1c7   : > { %4383 = vmatpush1.bf16.msra.mxu1 %v6100_v41  ;;  %2477 = vmatprep.subr.bf16.mxu0 %v6105_v42  ;;  %v7192_v41 = vcombine.high %v7184_v37, %v7184_v37  ;;  %v6186_v42 = vld [vmem:[#allocation11 + $0x630] ss:$24 sps:$4 sm:$0xff]  }
 0x1c8   : > { %4384 = vmatprep.subr.bf16.mxu1 %v6108_v43  ;;  %v6191_v43 = vld [vmem:[#allocation8 + $0x674] ss:$24 sps:$4 sm:$0xff]  }
 0x1ca   : > { %2478 = vmatpush1.bf16.msra.mxu0 %v6103_v30  ;;  %v6194_v30 = vld [vmem:[#allocation11 + $0x664] ss:$24 sps:$4 sm:$0xff]  }
 0x1cb   : > { %4385 = vmatpush1.bf16.msra.mxu1 %v6106_v44  ;;  %2479 = vmatprep.subr.bf16.mxu0 %v6111_v45  ;;  %v6189_v44 = vld [vmem:[#allocation8 + $0x670] ss:$24 sps:$4 sm:$0xff]  }
 0x1cc   : > { %4386 = vmatprep.subr.bf16.mxu1 %v6114_v46  ;;  %v6192_v45 = vld [vmem:[#allocation11 + $0x660] ss:$24 sps:$4 sm:$0xff]   ;;  %v6200_v46 = vld [vmem:[#allocation11 + $0x694] ss:$24 sps:$4 sm:$0xff]  }
 0x1ce   : > { %2480 = vmatpush1.bf16.msra.mxu0 %v6109_v47  ;;  %v6195_v47 = vld [vmem:[#allocation8 + $0x6a0] ss:$24 sps:$4 sm:$0xff]  }
 0x1cf   : > { %4387 = vmatpush1.bf16.msra.mxu1 %v6112_v49  ;;  %2481 = vmatprep.subr.bf16.mxu0 %v6117_v50  ;;  %v6198_v49 = vld [vmem:[#allocation11 + $0x690] ss:$24 sps:$4 sm:$0xff]  }
 0x1d0   : > { %4388 = vmatprep.subr.bf16.mxu1 %v6120_v51  ;;  %v6203_v50 = vld [vmem:[#allocation8 + $0x6d4] ss:$24 sps:$4 sm:$0xff]  }
 0x1d1   : > { %v6206_v51 = vld [vmem:[#allocation11 + $0x6c4] ss:$24 sps:$4 sm:$0xff]  }
 0x1d2   : > { %2482 = vmatpush1.bf16.msra.mxu0 %v6115_v52  ;;  %v6204_v52 = vld [vmem:[#allocation11 + $0x6c0] ss:$24 sps:$4 sm:$0xff]  }
 0x1d3   : > { %4389 = vmatpush1.bf16.msra.mxu1 %v6118_v53  ;;  %2483 = vmatprep.subr.bf16.mxu0 %v6123_v54  ;;  %v6209_v53 = vld [vmem:[#allocation8 + $0x704] ss:$24 sps:$4 sm:$0xff]  }
 0x1d4   : > { %4390 = vmatprep.subr.bf16.mxu1 %v6126_v55  ;;  %v6212_v54 = vld [vmem:[#allocation11 + $0x6f4] ss:$24 sps:$4 sm:$0xff]  }
 0x1d5   : > { %v6207_v55 = vld [vmem:[#allocation8 + $0x700] ss:$24 sps:$4 sm:$0xff]  }
 0x1d6   : > { %2484 = vmatpush1.bf16.msra.mxu0 %v6121_v56  ;;  %v6210_v56 = vld [vmem:[#allocation11 + $0x6f0] ss:$24 sps:$4 sm:$0xff]  }
 0x1d7   : > { %4391 = vmatpush1.bf16.msra.mxu1 %v6124_v57  ;;  %2485 = vmatprep.subr.bf16.mxu0 %v6129_v58  ;;  %v6215_v57 = vld [vmem:[#allocation8 + $0x734] ss:$24 sps:$4 sm:$0xff]  }
 0x1d8   : > { %4392 = vmatprep.subr.bf16.mxu1 %v6132_v59  ;;  %v6218_v58 = vld [vmem:[#allocation11 + $0x724] ss:$24 sps:$4 sm:$0xff]  }
 0x1d9   : > { %v6213_v59 = vld [vmem:[#allocation8 + $0x730] ss:$24 sps:$4 sm:$0xff]  }
 0x1da   : > { %2486 = vmatpush1.bf16.msra.mxu0 %v6127_v60  ;;  %v6216_v60 = vld [vmem:[#allocation11 + $0x720] ss:$24 sps:$4 sm:$0xff]  }
 0x1db   : > { %4393 = vmatpush1.bf16.msra.mxu1 %v6130_v61  ;;  %2487 = vmatprep.subr.bf16.mxu0 %v6135_v62  ;;  %v6221_v61 = vld [vmem:[#allocation8 + $0x764] ss:$24 sps:$4 sm:$0xff]  }
 0x1dc   : > { %4394 = vmatprep.subr.bf16.mxu1 %v6138_v63  ;;  %v6224_v62 = vld [vmem:[#allocation11 + $0x754] ss:$24 sps:$4 sm:$0xff]  }
 0x1dd   : > { %v6219_v63 = vld [vmem:[#allocation8 + $0x760] ss:$24 sps:$4 sm:$0xff]  }
 0x1de   : > { %2488 = vmatpush1.bf16.msra.mxu0 %v6133_v0  ;;  %v6222_v0 = vld [vmem:[#allocation11 + $0x750] ss:$24 sps:$4 sm:$0xff]  }
 0x1df   : > { %4395 = vmatpush1.bf16.msra.mxu1 %v6136_v1  ;;  %2489 = vmatprep.subr.bf16.mxu0 %v6141_v2  ;;  %v6227_v1 = vld [vmem:[#allocation8 + $0x794] ss:$24 sps:$4 sm:$0xff]  }
 0x1e0   : > { %4396 = vmatprep.subr.bf16.mxu1 %v6144_v3  ;;  %v6230_v2 = vld [vmem:[#allocation11 + $0x784] ss:$24 sps:$4 sm:$0xff]  }
 0x1e1   : > { %v6225_v3 = vld [vmem:[#allocation8 + $0x790] ss:$24 sps:$4 sm:$0xff]  }
 0x1e2   : > { %2490 = vmatpush1.bf16.msra.mxu0 %v6139_v4  ;;  %v6228_v4 = vld [vmem:[#allocation11 + $0x780] ss:$24 sps:$4 sm:$0xff]  }
 0x1e3   : > { %4397 = vmatpush1.bf16.msra.mxu1 %v6142_v6  ;;  %2491 = vmatprep.subr.bf16.mxu0 %v6147_v7  ;;  %v6233_v6 = vld [vmem:[#allocation8 + $0x7c4] ss:$24 sps:$4 sm:$0xff]  }
 0x1e4   : > { %4398 = vmatprep.subr.bf16.mxu1 %v6150_v8  ;;  %v6236_v7 = vld [vmem:[#allocation11 + $0x7b4] ss:$24 sps:$4 sm:$0xff]  }
 0x1e5   : > { %v6231_v8 = vld [vmem:[#allocation8 + $0x7c0] ss:$24 sps:$4 sm:$0xff]  }
 0x1e6   : > { %2492 = vmatpush1.bf16.msra.mxu0 %v6145_v10  ;;  %v6234_v10 = vld [vmem:[#allocation11 + $0x7b0] ss:$24 sps:$4 sm:$0xff]  }
 0x1e7   : > { %4399 = vmatpush1.bf16.msra.mxu1 %v6148_v11  ;;  %2493 = vmatprep.subr.bf16.mxu0 %v6153_v12  ;;  %v6239_v11 = vld [vmem:[#allocation8 + $0x7f4] ss:$24 sps:$4 sm:$0xff]  }
 0x1e8   : > { %4400 = vmatprep.subr.bf16.mxu1 %v6156_v14  ;;  %v6242_v12 = vld [vmem:[#allocation11 + $0x7e4] ss:$24 sps:$4 sm:$0xff]  }
 0x1e9   : > { %v6237_v14 = vld [vmem:[#allocation8 + $0x7f0] ss:$24 sps:$4 sm:$0xff]  }
 0x1ea   : > { %2494 = vmatpush1.bf16.msra.mxu0 %v6151_v16  ;;  %v6240_v16 = vld [vmem:[#allocation11 + $0x7e0] ss:$24 sps:$4 sm:$0xff]  }
 0x1eb   : > { %4401 = vmatpush1.bf16.msra.mxu1 %v6154_v17  ;;  %2495 = vmatprep.subr.bf16.mxu0 %v6159_v18  ;;  %v6245_v17 = vld [vmem:[#allocation8 + $0x824] ss:$24 sps:$4 sm:$0xff]  }
 0x1ec   : > { %4402 = vmatprep.subr.bf16.mxu1 %v6162_v20  ;;  %v6248_v18 = vld [vmem:[#allocation11 + $0x814] ss:$24 sps:$4 sm:$0xff]  }
 0x1ed   : > { %v6243_v20 = vld [vmem:[#allocation8 + $0x820] ss:$24 sps:$4 sm:$0xff]  }
 0x1ee   : > { %2496 = vmatpush1.bf16.msra.mxu0 %v6157_v22  ;;  %v6246_v22 = vld [vmem:[#allocation11 + $0x810] ss:$24 sps:$4 sm:$0xff]  }
 0x1ef   : > { %4403 = vmatpush1.bf16.msra.mxu1 %v6160_v23  ;;  %2497 = vmatprep.subr.bf16.mxu0 %v6165_v25  ;;  %v6251_v23 = vld [vmem:[#allocation8 + $0x854] ss:$24 sps:$4 sm:$0xff]  }
 0x1f0   : > { %4404 = vmatprep.subr.bf16.mxu1 %v6168_v13  ;;  %v6254_v25 = vld [vmem:[#allocation11 + $0x844] ss:$24 sps:$4 sm:$0xff]  }
 0x1f1   : > { %v6249_v13 = vld [vmem:[#allocation8 + $0x850] ss:$24 sps:$4 sm:$0xff]  }
 0x1f2   : > { %2498 = vmatpush1.bf16.msra.mxu0 %v6163_v26  ;;  %v6252_v26 = vld [vmem:[#allocation11 + $0x840] ss:$24 sps:$4 sm:$0xff]  }
 0x1f3   : > { %4405 = vmatpush1.bf16.msra.mxu1 %v6166_v27  ;;  %2499 = vmatprep.subr.bf16.mxu0 %v6171_v31  ;;  %v6257_v27 = vld [vmem:[#allocation8 + $0x884] ss:$24 sps:$4 sm:$0xff]  }
 0x1f4   : > { %4406 = vmatprep.subr.bf16.mxu1 %v6174_v32  ;;  %v6260_v31 = vld [vmem:[#allocation11 + $0x874] ss:$24 sps:$4 sm:$0xff]  }
 0x1f5   : > { %v6255_v32 = vld [vmem:[#allocation8 + $0x880] ss:$24 sps:$4 sm:$0xff]  }
 0x1f6   : > { %2500 = vmatpush1.bf16.msra.mxu0 %v6169_v33  ;;  %v6258_v33 = vld [vmem:[#allocation11 + $0x870] ss:$24 sps:$4 sm:$0xff]  }
 0x1f7   : > { %4407 = vmatpush1.bf16.msra.mxu1 %v6172_v21  ;;  %2510 = vmatprep.subr.bf16.mxu0 %v6177_v35  ;;  %v6263_v21 = vld [vmem:[#allocation8 + $0x8b4] ss:$24 sps:$4 sm:$0xff]  }
 0x1f8   : > { %4417 = vmatprep.subr.bf16.mxu1 %v6182_v36  ;;  %v6266_v35 = vld [vmem:[#allocation11 + $0x8a4] ss:$24 sps:$4 sm:$0xff]  }
 0x1f9   : > { %2502 = vmatmul.mubr.bf16.vlgmr.msra.gmra.mrb[4].mxu0 %v7140_v9  ;;  %v6197_v9 = vld [vmem:[#allocation8 + $0x6a4] ss:$24 sps:$4 sm:$0xff]   ;;  %v6261_v36 = vld [vmem:[#allocation8 + $0x8b0] ss:$24 sps:$4 sm:$0xff]  }
 0x1fa   : > { %4409 = vmatmul.mubr.bf16.vlgmr.msra.gmra.mrb[4].mxu1 %v7188_v48  ;;  %2511 = vmatpush1.bf16.msra.mxu0 %v6175_v38  ;;  %v6264_v38 = vld [vmem:[#allocation11 + $0x8a0] ss:$24 sps:$4 sm:$0xff]  }
 0x1fb   : > { %4418 = vmatpush1.bf16.msra.mxu1 %v6180_v5  ;;  %2512 = vmatprep.subr.bf16.mxu0 %v6185_v39  ;;  %v6269_v5 = vld [vmem:[#allocation8 + $0x8e4] ss:$24 sps:$4 sm:$0xff]  }
 0x1fc   : > { %4419 = vmatprep.subr.bf16.mxu1 %v6188_v40  ;;  %2542 = vmatprep.mubr.bf16.mxu0 %v7147_v15  ;;  %v6201_v15 = vld [vmem:[#allocation8 + $0x6d0] ss:$24 sps:$4 sm:$0xff]   ;;  %v6267_v40 = vld [vmem:[#allocation8 + $0x8e0] ss:$24 sps:$4 sm:$0xff]  }
 0x1fd   : > { %4449 = vmatprep.mubr.bf16.mxu1 %v7192_v41  ;;  %v6272_v39 = vld [vmem:[#allocation11 + $0x8d4] ss:$24 sps:$4 sm:$0xff]  }
 0x1fe   : > { %2513 = vmatpush1.bf16.msra.mxu0 %v6183_v29  ;;  %v6270_v29 = vld [vmem:[#allocation11 + $0x8d0] ss:$24 sps:$4 sm:$0xff]  }
 0x1ff   : > { %4420 = vmatpush1.bf16.msra.mxu1 %v6186_v42  ;;  %2514 = vmatprep.subr.bf16.mxu0 %v6191_v43  ;;  %v6277_v42 = vld [vmem:[#allocation11 + $0xc] ss:$24 sps:$4 sm:$0xff]  }
 0x200   : > { %4421 = vmatprep.subr.bf16.mxu1 %v6194_v30  ;;  %v6280_v43 = vld [vmem:[#allocation11 + $0x14] ss:$24 sps:$4 sm:$0xff]   ;;  %v7200_v30 = vcombine.low %v7184_v37, %v7184_v37 }
 0x201   : > { %v6289_v37 = vld [vmem:[#allocation11 + $0x6c] ss:$24 sps:$4 sm:$0xff]  }
 0x202   : > { %2515 = vmatpush1.bf16.msra.mxu0 %v6189_v44  ;;  %v6275_v44 = vld [vmem:[#allocation11 + $0x8] ss:$24 sps:$4 sm:$0xff]  }
 0x203   : > { %4422 = vmatpush1.bf16.msra.mxu1 %v6192_v45  ;;  %2516 = vmatprep.subr.bf16.mxu0 %v6197_v9  ;;  %v6278_v45 = vld [vmem:[#allocation11 + $0x10] ss:$24 sps:$4 sm:$0xff]   ;;  %v6283_v9 = vld [vmem:[#allocation11 + $0x3c] ss:$24 sps:$4 sm:$0xff]  }
 0x204   : > { %4423 = vmatprep.subr.bf16.mxu1 %v6200_v46  ;;  %v6286_v46 = vld [vmem:[#allocation11 + $0x44] ss:$24 sps:$4 sm:$0xff]  }
 0x206   : > { %2517 = vmatpush1.bf16.msra.mxu0 %v6195_v47  ;;  %v6281_v47 = vld [vmem:[#allocation11 + $0x38] ss:$24 sps:$4 sm:$0xff]  }
 0x207   : > { %4424 = vmatpush1.bf16.msra.mxu1 %v6198_v49  ;;  %2518 = vmatprep.subr.bf16.mxu0 %v6203_v50  ;;  %v6284_v49 = vld [vmem:[#allocation11 + $0x40] ss:$24 sps:$4 sm:$0xff]   ;;  %v6292_v50 = vld [vmem:[#allocation11 + $0x74] ss:$24 sps:$4 sm:$0xff]  }
 0x208   : > { %4425 = vmatprep.subr.bf16.mxu1 %v6206_v51  ;;  %v6287_v51 = vld [vmem:[#allocation11 + $0x68] ss:$24 sps:$4 sm:$0xff]  }
 0x20a   : > { %2519 = vmatpush1.bf16.msra.mxu0 %v6201_v15  ;;  %v6290_v15 = vld [vmem:[#allocation11 + $0x70] ss:$24 sps:$4 sm:$0xff]  }
 0x20b   : > { %4426 = vmatpush1.bf16.msra.mxu1 %v6204_v52  ;;  %2520 = vmatprep.subr.bf16.mxu0 %v6209_v53  ;;  %v6298_v52 = vld [vmem:[#allocation11 + $0xa4] ss:$24 sps:$4 sm:$0xff]   ;;  %v6293_v53 = vld [vmem:[#allocation11 + $0x98] ss:$24 sps:$4 sm:$0xff]  }
 0x20c   : > { %4427 = vmatprep.subr.bf16.mxu1 %v6212_v54  ;;  %v6296_v54 = vld [vmem:[#allocation11 + $0xa0] ss:$24 sps:$4 sm:$0xff]  }
 0x20e   : > { %2521 = vmatpush1.bf16.msra.mxu0 %v6207_v55  ;;  %v6301_v55 = vld [vmem:[#allocation11 + $0xcc] ss:$24 sps:$4 sm:$0xff]  }
 0x20f   : > { %4428 = vmatpush1.bf16.msra.mxu1 %v6210_v56  ;;  %2522 = vmatprep.subr.bf16.mxu0 %v6215_v57  ;;  %v6304_v56 = vld [vmem:[#allocation11 + $0xd4] ss:$24 sps:$4 sm:$0xff]   ;;  %v6299_v57 = vld [vmem:[#allocation11 + $0xc8] ss:$24 sps:$4 sm:$0xff]  }
 0x210   : > { %4429 = vmatprep.subr.bf16.mxu1 %v6218_v58  ;;  %v6307_v58 = vld [vmem:[#allocation11 + $0xfc] ss:$24 sps:$4 sm:$0xff]  }
 0x212   : > { %2523 = vmatpush1.bf16.msra.mxu0 %v6213_v59  ;;  %v6310_v59 = vld [vmem:[#allocation11 + $0x104] ss:$24 sps:$4 sm:$0xff]  }
 0x213   : > { %4430 = vmatpush1.bf16.msra.mxu1 %v6216_v60  ;;  %2524 = vmatprep.subr.bf16.mxu0 %v6221_v61  ;;  %v6305_v60 = vld [vmem:[#allocation11 + $0xf8] ss:$24 sps:$4 sm:$0xff]  }
 0x214   : > { %4431 = vmatprep.subr.bf16.mxu1 %v6224_v62  ;;  %v6308_v61 = vld [vmem:[#allocation11 + $0x100] ss:$24 sps:$4 sm:$0xff]   ;;  %v6313_v62 = vld [vmem:[#allocation11 + $0x12c] ss:$24 sps:$4 sm:$0xff]  }
 0x216   : > { %2525 = vmatpush1.bf16.msra.mxu0 %v6219_v63  ;;  %v6316_v63 = vld [vmem:[#allocation11 + $0x134] ss:$24 sps:$4 sm:$0xff]  }
 0x217   : > { %4432 = vmatpush1.bf16.msra.mxu1 %v6222_v0  ;;  %2526 = vmatprep.subr.bf16.mxu0 %v6227_v1 }
 0x218   : > { %4433 = vmatprep.subr.bf16.mxu1 %v6230_v2 }
 0x21a   : > { %2527 = vmatpush1.bf16.msra.mxu0 %v6225_v3 }
 0x21b   : > { %4434 = vmatpush1.bf16.msra.mxu1 %v6228_v4  ;;  %2528 = vmatprep.subr.bf16.mxu0 %v6233_v6 }
 0x21c   : > { %4435 = vmatprep.subr.bf16.mxu1 %v6236_v7  ;;  %v6311_v7 = vld [vmem:[#allocation11 + $0x128] ss:$24 sps:$4 sm:$0xff]  }
 0x21e   : > { %2529 = vmatpush1.bf16.msra.mxu0 %v6231_v8  ;;  %v6314_v8 = vld [vmem:[#allocation11 + $0x130] ss:$24 sps:$4 sm:$0xff]  }
 0x21f   : > { %4436 = vmatpush1.bf16.msra.mxu1 %v6234_v10  ;;  %2530 = vmatprep.subr.bf16.mxu0 %v6239_v11 }
 0x220   : > { %4437 = vmatprep.subr.bf16.mxu1 %v6242_v12  ;;  %v6319_v12 = vld [vmem:[#allocation11 + $0x15c] ss:$24 sps:$4 sm:$0xff]  }
 0x222   : > { %2531 = vmatpush1.bf16.msra.mxu0 %v6237_v14  ;;  %v6322_v14 = vld [vmem:[#allocation11 + $0x164] ss:$24 sps:$4 sm:$0xff]  }
 0x223   : > { %4438 = vmatpush1.bf16.msra.mxu1 %v6240_v16  ;;  %2532 = vmatprep.subr.bf16.mxu0 %v6245_v17  ;;  %v6317_v16 = vld [vmem:[#allocation11 + $0x158] ss:$24 sps:$4 sm:$0xff]  }
 0x224   : > { %4439 = vmatprep.subr.bf16.mxu1 %v6248_v18  ;;  %v6320_v17 = vld [vmem:[#allocation11 + $0x160] ss:$24 sps:$4 sm:$0xff]   ;;  %v6325_v18 = vld [vmem:[#allocation11 + $0x18c] ss:$24 sps:$4 sm:$0xff]  }
 0x226   : > { %2533 = vmatpush1.bf16.msra.mxu0 %v6243_v20  ;;  %v6328_v20 = vld [vmem:[#allocation11 + $0x194] ss:$24 sps:$4 sm:$0xff]  }
 0x227   : > { %4440 = vmatpush1.bf16.msra.mxu1 %v6246_v22  ;;  %2534 = vmatprep.subr.bf16.mxu0 %v6251_v23  ;;  %v6323_v22 = vld [vmem:[#allocation11 + $0x188] ss:$24 sps:$4 sm:$0xff]  }
 0x228   : > { %4441 = vmatprep.subr.bf16.mxu1 %v6254_v25  ;;  %v6326_v23 = vld [vmem:[#allocation11 + $0x190] ss:$24 sps:$4 sm:$0xff]   ;;  %v6331_v25 = vld [vmem:[#allocation11 + $0x1bc] ss:$24 sps:$4 sm:$0xff]  }
 0x22a   : > { %2535 = vmatpush1.bf16.msra.mxu0 %v6249_v13  ;;  %v6334_v13 = vld [vmem:[#allocation11 + $0x1c4] ss:$24 sps:$4 sm:$0xff]  }
 0x22b   : > { %4442 = vmatpush1.bf16.msra.mxu1 %v6252_v26  ;;  %2536 = vmatprep.subr.bf16.mxu0 %v6257_v27  ;;  %v6329_v26 = vld [vmem:[#allocation11 + $0x1b8] ss:$24 sps:$4 sm:$0xff]  }
 0x22c   : > { %4443 = vmatprep.subr.bf16.mxu1 %v6260_v31  ;;  %v6332_v27 = vld [vmem:[#allocation11 + $0x1c0] ss:$24 sps:$4 sm:$0xff]   ;;  %v6337_v31 = vld [vmem:[#allocation11 + $0x1ec] ss:$24 sps:$4 sm:$0xff]  }
 0x22e   : > { %2537 = vmatpush1.bf16.msra.mxu0 %v6255_v32  ;;  %v6340_v32 = vld [vmem:[#allocation11 + $0x1f4] ss:$24 sps:$4 sm:$0xff]  }
 0x22f   : > { %4444 = vmatpush1.bf16.msra.mxu1 %v6258_v33  ;;  %2538 = vmatprep.subr.bf16.mxu0 %v6263_v21  ;;  %v6335_v33 = vld [vmem:[#allocation11 + $0x1e8] ss:$24 sps:$4 sm:$0xff]  }
 0x230   : > { %4445 = vmatprep.subr.bf16.mxu1 %v6266_v35  ;;  %v6338_v21 = vld [vmem:[#allocation11 + $0x1f0] ss:$24 sps:$4 sm:$0xff]   ;;  %v6343_v35 = vld [vmem:[#allocation11 + $0x21c] ss:$24 sps:$4 sm:$0xff]  }
 0x232   : > { %2539 = vmatpush1.bf16.msra.mxu0 %v6261_v36  ;;  %v6346_v36 = vld [vmem:[#allocation11 + $0x224] ss:$24 sps:$4 sm:$0xff]  }
 0x233   : > { %4446 = vmatpush1.bf16.msra.mxu1 %v6264_v38  ;;  %2540 = vmatprep.subr.bf16.mxu0 %v6269_v5  ;;  %v6341_v38 = vld [vmem:[#allocation11 + $0x218] ss:$24 sps:$4 sm:$0xff]  }
 0x234   : > { %4447 = vmatprep.subr.bf16.mxu1 %v6272_v39  ;;  %v6344_v5 = vld [vmem:[#allocation11 + $0x220] ss:$24 sps:$4 sm:$0xff]   ;;  %v6349_v39 = vld [vmem:[#allocation11 + $0x24c] ss:$24 sps:$4 sm:$0xff]  }
 0x236   : > { %2541 = vmatpush1.bf16.msra.mxu0 %v6267_v40  ;;  %v6352_v40 = vld [vmem:[#allocation11 + $0x254] ss:$24 sps:$4 sm:$0xff]  }
 0x237   : > { %4448 = vmatpush1.bf16.msra.mxu1 %v6270_v29  ;;  %4458 = vmatprep.subr.bf16.mxu0 %v6277_v42  ;;  %v6347_v29 = vld [vmem:[#allocation11 + $0x248] ss:$24 sps:$4 sm:$0xff]  }
 0x238   : > { %4581 = vmatprep.subr.bf16.mxu1 %v6280_v43  ;;  %v6350_v42 = vld [vmem:[#allocation11 + $0x250] ss:$24 sps:$4 sm:$0xff]   ;;  %v6355_v43 = vld [vmem:[#allocation11 + $0x27c] ss:$24 sps:$4 sm:$0xff]  }
 0x239   : > { %2543 = vmatmul.mubr.bf16.vlgmr.msra.gmra.mrb[4].mxu0 %v7155_v19  ;;  %v6295_v19 = vld [vmem:[#allocation11 + $0x9c] ss:$24 sps:$4 sm:$0xff]  }
 0x23a   : > { %4450 = vmatmul.mubr.bf16.vlgmr.msra.gmra.mrb[4].mxu1 %v7200_v30  ;;  %4459 = vmatpush1.bf16.msra.mxu0 %v6275_v44  ;;  %v6358_v44 = vld [vmem:[#allocation11 + $0x284] ss:$24 sps:$4 sm:$0xff]  }
 0x23b   : > { %4582 = vmatpush1.bf16.msra.mxu1 %v6278_v45  ;;  %4460 = vmatprep.subr.bf16.mxu0 %v6283_v9  ;;  %v6353_v45 = vld [vmem:[#allocation11 + $0x278] ss:$24 sps:$4 sm:$0xff]  }
 0x23c   : > { %4583 = vmatprep.subr.bf16.mxu1 %v6286_v46  ;;  %4490 = vmatprep.mubr.bf16.mxu0 %v7162_v24  ;;  %v6356_v9 = vld [vmem:[#allocation11 + $0x280] ss:$24 sps:$4 sm:$0xff]   ;;  %v6361_v46 = vld [vmem:[#allocation11 + $0x2ac] ss:$24 sps:$4 sm:$0xff]  }
 0x23d   : > { %4613 = vmatprep.mubr.bf16.mxu1 %v7162_v24  ;;  %v6302_v24 = vld [vmem:[#allocation11 + $0xd0] ss:$24 sps:$4 sm:$0xff]  }
 0x23e   : > { %4461 = vmatpush1.bf16.msra.mxu0 %v6281_v47  ;;  %v6364_v47 = vld [vmem:[#allocation11 + $0x2b4] ss:$24 sps:$4 sm:$0xff]  }
 0x23f   : > { %4584 = vmatpush1.bf16.msra.mxu1 %v6284_v49  ;;  %4462 = vmatprep.subr.bf16.mxu0 %v6289_v37  ;;  %v6359_v49 = vld [vmem:[#allocation11 + $0x2a8] ss:$24 sps:$4 sm:$0xff]  }
 0x240   : > { %4585 = vmatprep.subr.bf16.mxu1 %v6292_v50  ;;  %v6362_v37 = vld [vmem:[#allocation11 + $0x2b0] ss:$24 sps:$4 sm:$0xff]   ;;  %v6367_v50 = vld [vmem:[#allocation11 + $0x2dc] ss:$24 sps:$4 sm:$0xff]  }
 0x242   : > { %4463 = vmatpush1.bf16.msra.mxu0 %v6287_v51  ;;  %v6370_v51 = vld [vmem:[#allocation11 + $0x2e4] ss:$24 sps:$4 sm:$0xff]  }
 0x243   : > { %4586 = vmatpush1.bf16.msra.mxu1 %v6290_v15  ;;  %4464 = vmatprep.subr.bf16.mxu0 %v6295_v19  ;;  %v6365_v15 = vld [vmem:[#allocation11 + $0x2d8] ss:$24 sps:$4 sm:$0xff]  }
 0x244   : > { %4587 = vmatprep.subr.bf16.mxu1 %v6298_v52  ;;  %v6368_v19 = vld [vmem:[#allocation11 + $0x2e0] ss:$24 sps:$4 sm:$0xff]   ;;  %v6373_v52 = vld [vmem:[#allocation11 + $0x30c] ss:$24 sps:$4 sm:$0xff]  }
 0x246   : > { %4465 = vmatpush1.bf16.msra.mxu0 %v6293_v53  ;;  %v6376_v53 = vld [vmem:[#allocation11 + $0x314] ss:$24 sps:$4 sm:$0xff]  }
 0x247   : > { %4588 = vmatpush1.bf16.msra.mxu1 %v6296_v54  ;;  %4466 = vmatprep.subr.bf16.mxu0 %v6301_v55  ;;  %v6371_v54 = vld [vmem:[#allocation11 + $0x308] ss:$24 sps:$4 sm:$0xff]  }
 0x248   : > { %4589 = vmatprep.subr.bf16.mxu1 %v6304_v56  ;;  %v6374_v55 = vld [vmem:[#allocation11 + $0x310] ss:$24 sps:$4 sm:$0xff]   ;;  %v6379_v56 = vld [vmem:[#allocation11 + $0x33c] ss:$24 sps:$4 sm:$0xff]  }
 0x24a   : > { %4467 = vmatpush1.bf16.msra.mxu0 %v6299_v57  ;;  %v6382_v57 = vld [vmem:[#allocation11 + $0x344] ss:$24 sps:$4 sm:$0xff]  }
 0x24b   : > { %4590 = vmatpush1.bf16.msra.mxu1 %v6302_v24  ;;  %4468 = vmatprep.subr.bf16.mxu0 %v6307_v58  ;;  %v6377_v24 = vld [vmem:[#allocation11 + $0x338] ss:$24 sps:$4 sm:$0xff]  }
 0x24c   : > { %4591 = vmatprep.subr.bf16.mxu1 %v6310_v59  ;;  %v7206_v0 = vpop.f32.mrb[0].mxu0  ;;  %v6380_v58 = vld [vmem:[#allocation11 + $0x340] ss:$24 sps:$4 sm:$0xff]   ;;  %v6385_v59 = vld [vmem:[#allocation11 + $0x36c] ss:$24 sps:$4 sm:$0xff]  }
 0x24d   : > { %v7208_v1 = vpop.f32.mrb[0].mxu1  ;;  %v7210_v2 = vpop.f32.mrb[1].mxu0 }
 0x24e   : > { %v7212_v3 = vpop.f32.mrb[1].mxu1  ;;  %v2302_v4 = vpop.f32.mrb[2].mxu0  ;;  %4469 = vmatpush1.bf16.msra.mxu0 %v6305_v60  ;;  %v6388_v60 = vld [vmem:[#allocation11 + $0x374] ss:$24 sps:$4 sm:$0xff]  }
 0x24f   : > { %v2425_v6 = vpop.f32.mrb[2].mxu1  ;;  %4592 = vmatpush1.bf16.msra.mxu1 %v6308_v61  ;;  %v2303_v10 = vpop.f32.mrb[3].mxu0  ;;  %4470 = vmatprep.subr.bf16.mxu0 %v6313_v62  ;;  %v6383_v61 = vld [vmem:[#allocation11 + $0x368] ss:$24 sps:$4 sm:$0xff]   ;;  %v6389_v4 = vld [vmem:[#allocation11 + $0x398] ss:$24 sps:$4 sm:$0xff]  }
 0x250   : > { %v2426_v11 = vpop.f32.mrb[3].mxu1  ;;  %4593 = vmatprep.subr.bf16.mxu1 %v6316_v63  ;;  %v6386_v62 = vld [vmem:[#allocation11 + $0x370] ss:$24 sps:$4 sm:$0xff]   ;;  %v6391_v63 = vld [vmem:[#allocation11 + $0x39c] ss:$24 sps:$4 sm:$0xff]  }
 0x251   : > { %v6392_v6 = vld [vmem:[#allocation11 + $0x3a0] ss:$24 sps:$4 sm:$0xff]   ;;  %v6403_v11 = vld [vmem:[#allocation11 + $0x3fc] ss:$24 sps:$4 sm:$0xff]  }
 0x252   : > { %4471 = vmatpush1.bf16.msra.mxu0 %v6311_v7  ;;  %v6397_v7 = vld [vmem:[#allocation11 + $0x3cc] ss:$24 sps:$4 sm:$0xff]   ;;  %v6395_v10 = vld [vmem:[#allocation11 + $0x3c8] ss:$24 sps:$4 sm:$0xff]  }
 0x253   : > { %4594 = vmatpush1.bf16.msra.mxu1 %v6314_v8  ;;  %4472 = vmatprep.subr.bf16.mxu0 %v6319_v12  ;;  %v6400_v8 = vld [vmem:[#allocation11 + $0x3d4] ss:$24 sps:$4 sm:$0xff]   ;;  %v6406_v12 = vld [vmem:[#allocation11 + $0x404] ss:$24 sps:$4 sm:$0xff]  }
 0x254   : > { %4595 = vmatprep.subr.bf16.mxu1 %v6322_v14  ;;  %v6401_v14 = vld [vmem:[#allocation11 + $0x3f8] ss:$24 sps:$4 sm:$0xff]  }
 0x256   : > { %4473 = vmatpush1.bf16.msra.mxu0 %v6317_v16  ;;  %v6404_v16 = vld [vmem:[#allocation11 + $0x400] ss:$24 sps:$4 sm:$0xff]  }
 0x257   : > { %4596 = vmatpush1.bf16.msra.mxu1 %v6320_v17  ;;  %4474 = vmatprep.subr.bf16.mxu0 %v6325_v18  ;;  %v6409_v17 = vld [vmem:[#allocation11 + $0x42c] ss:$24 sps:$4 sm:$0xff]  }
 0x258   : > { %4597 = vmatprep.subr.bf16.mxu1 %v6328_v20  ;;  %v6412_v18 = vld [vmem:[#allocation11 + $0x434] ss:$24 sps:$4 sm:$0xff]   ;;  %v6407_v20 = vld [vmem:[#allocation11 + $0x428] ss:$24 sps:$4 sm:$0xff]  }
 0x25a   : > { %4475 = vmatpush1.bf16.msra.mxu0 %v6323_v22  ;;  %v6410_v22 = vld [vmem:[#allocation11 + $0x430] ss:$24 sps:$4 sm:$0xff]  }
 0x25b   : > { %4598 = vmatpush1.bf16.msra.mxu1 %v6326_v23  ;;  %4476 = vmatprep.subr.bf16.mxu0 %v6331_v25  ;;  %v6415_v23 = vld [vmem:[#allocation11 + $0x45c] ss:$24 sps:$4 sm:$0xff]  }
 0x25c   : > { %4599 = vmatprep.subr.bf16.mxu1 %v6334_v13  ;;  %v6418_v25 = vld [vmem:[#allocation11 + $0x464] ss:$24 sps:$4 sm:$0xff]   ;;  %v6413_v13 = vld [vmem:[#allocation11 + $0x458] ss:$24 sps:$4 sm:$0xff]  }
 0x25e   : > { %4477 = vmatpush1.bf16.msra.mxu0 %v6329_v26  ;;  %v6416_v26 = vld [vmem:[#allocation11 + $0x460] ss:$24 sps:$4 sm:$0xff]  }
 0x25f   : > { %4600 = vmatpush1.bf16.msra.mxu1 %v6332_v27  ;;  %4478 = vmatprep.subr.bf16.mxu0 %v6337_v31  ;;  %v6421_v27 = vld [vmem:[#allocation11 + $0x48c] ss:$24 sps:$4 sm:$0xff]  }
 0x260   : > { %4601 = vmatprep.subr.bf16.mxu1 %v6340_v32  ;;  %v6424_v31 = vld [vmem:[#allocation11 + $0x494] ss:$24 sps:$4 sm:$0xff]   ;;  %v6419_v32 = vld [vmem:[#allocation11 + $0x488] ss:$24 sps:$4 sm:$0xff]  }
 0x262   : > { %4479 = vmatpush1.bf16.msra.mxu0 %v6335_v33  ;;  %v6422_v33 = vld [vmem:[#allocation11 + $0x490] ss:$24 sps:$4 sm:$0xff]  }
 0x263   : > { %4602 = vmatpush1.bf16.msra.mxu1 %v6338_v21  ;;  %4480 = vmatprep.subr.bf16.mxu0 %v6343_v35  ;;  %v6427_v21 = vld [vmem:[#allocation11 + $0x4bc] ss:$24 sps:$4 sm:$0xff]  }
 0x264   : > { %4603 = vmatprep.subr.bf16.mxu1 %v6346_v36  ;;  %v6430_v35 = vld [vmem:[#allocation11 + $0x4c4] ss:$24 sps:$4 sm:$0xff]   ;;  %v6425_v36 = vld [vmem:[#allocation11 + $0x4b8] ss:$24 sps:$4 sm:$0xff]  }
 0x266   : > { %4481 = vmatpush1.bf16.msra.mxu0 %v6341_v38  ;;  %v6428_v38 = vld [vmem:[#allocation11 + $0x4c0] ss:$24 sps:$4 sm:$0xff]  }
 0x267   : > { %4604 = vmatpush1.bf16.msra.mxu1 %v6344_v5  ;;  %4482 = vmatprep.subr.bf16.mxu0 %v6349_v39  ;;  %v6433_v5 = vld [vmem:[#allocation11 + $0x4ec] ss:$24 sps:$4 sm:$0xff]  }
 0x268   : > { %4605 = vmatprep.subr.bf16.mxu1 %v6352_v40  ;;  %v6436_v39 = vld [vmem:[#allocation11 + $0x4f4] ss:$24 sps:$4 sm:$0xff]   ;;  %v6431_v40 = vld [vmem:[#allocation11 + $0x4e8] ss:$24 sps:$4 sm:$0xff]  }
 0x26a   : > { %4483 = vmatpush1.bf16.msra.mxu0 %v6347_v29  ;;  %v6434_v29 = vld [vmem:[#allocation11 + $0x4f0] ss:$24 sps:$4 sm:$0xff]  }
 0x26b   : > { %4606 = vmatpush1.bf16.msra.mxu1 %v6350_v42  ;;  %4484 = vmatprep.subr.bf16.mxu0 %v6355_v43  ;;  %v6439_v42 = vld [vmem:[#allocation11 + $0x51c] ss:$24 sps:$4 sm:$0xff]  }
 0x26c   : > { %4607 = vmatprep.subr.bf16.mxu1 %v6358_v44  ;;  %v6442_v43 = vld [vmem:[#allocation11 + $0x524] ss:$24 sps:$4 sm:$0xff]   ;;  %v6437_v44 = vld [vmem:[#allocation11 + $0x518] ss:$24 sps:$4 sm:$0xff]  }
 0x26e   : > { %4485 = vmatpush1.bf16.msra.mxu0 %v6353_v45  ;;  %v6440_v45 = vld [vmem:[#allocation11 + $0x520] ss:$24 sps:$4 sm:$0xff]  }
 0x26f   : > { %4608 = vmatpush1.bf16.msra.mxu1 %v6356_v9  ;;  %4486 = vmatprep.subr.bf16.mxu0 %v6361_v46  ;;  %v6445_v9 = vld [vmem:[#allocation11 + $0x54c] ss:$24 sps:$4 sm:$0xff]  }
 0x270   : > { %4609 = vmatprep.subr.bf16.mxu1 %v6364_v47  ;;  %v6448_v46 = vld [vmem:[#allocation11 + $0x554] ss:$24 sps:$4 sm:$0xff]   ;;  %v6443_v47 = vld [vmem:[#allocation11 + $0x548] ss:$24 sps:$4 sm:$0xff]  }
 0x272   : > { %4487 = vmatpush1.bf16.msra.mxu0 %v6359_v49  ;;  %v6446_v49 = vld [vmem:[#allocation11 + $0x550] ss:$24 sps:$4 sm:$0xff]  }
 0x273   : > { %4610 = vmatpush1.bf16.msra.mxu1 %v6362_v37  ;;  %4488 = vmatprep.subr.bf16.mxu0 %v6367_v50  ;;  %v6451_v37 = vld [vmem:[#allocation11 + $0x57c] ss:$24 sps:$4 sm:$0xff]  }
 0x274   : > { %4611 = vmatprep.subr.bf16.mxu1 %v6370_v51  ;;  %v6454_v50 = vld [vmem:[#allocation11 + $0x584] ss:$24 sps:$4 sm:$0xff]   ;;  %v6449_v51 = vld [vmem:[#allocation11 + $0x578] ss:$24 sps:$4 sm:$0xff]  }
 0x276   : > { %4489 = vmatpush1.bf16.msra.mxu0 %v6365_v15  ;;  %v6452_v15 = vld [vmem:[#allocation11 + $0x580] ss:$24 sps:$4 sm:$0xff]  }
 0x277   : > { %4612 = vmatpush1.bf16.msra.mxu1 %v6368_v19  ;;  %4499 = vmatprep.subr.bf16.mxu0 %v6373_v52  ;;  %v6457_v19 = vld [vmem:[#allocation11 + $0x5ac] ss:$24 sps:$4 sm:$0xff]  }
 0x278   : > { %4622 = vmatprep.subr.bf16.mxu1 %v6376_v53  ;;  %v6460_v52 = vld [vmem:[#allocation11 + $0x5b4] ss:$24 sps:$4 sm:$0xff]   ;;  %v6455_v53 = vld [vmem:[#allocation11 + $0x5a8] ss:$24 sps:$4 sm:$0xff]  }
 0x279   : > { %4491 = vmatmul.mubr.bf16.vlgmr.msra.gmra.mrb[8].mxu0 %v7170_v28 }
 0x27a   : > { %4614 = vmatmul.mubr.bf16.vlgmr.msra.gmra.mrb[8].mxu1 %v7170_v28  ;;  %4500 = vmatpush1.bf16.msra.mxu0 %v6371_v54  ;;  %v6394_v28 = vld [vmem:[#allocation11 + $0x3a4] ss:$24 sps:$4 sm:$0xff]   ;;  %v6458_v54 = vld [vmem:[#allocation11 + $0x5b0] ss:$24 sps:$4 sm:$0xff]  }
 0x27b   : > { %4623 = vmatpush1.bf16.msra.mxu1 %v6374_v55  ;;  %4501 = vmatprep.subr.bf16.mxu0 %v6379_v56  ;;  %v6463_v55 = vld [vmem:[#allocation11 + $0x5dc] ss:$24 sps:$4 sm:$0xff]  }
 0x27c   : > { %4624 = vmatprep.subr.bf16.mxu1 %v6382_v57  ;;  %4531 = vmatprep.mubr.bf16.mxu0 %v7177_v34  ;;  %v6466_v56 = vld [vmem:[#allocation11 + $0x5e4] ss:$24 sps:$4 sm:$0xff]   ;;  %v6461_v57 = vld [vmem:[#allocation11 + $0x5d8] ss:$24 sps:$4 sm:$0xff]  }
 0x27d   : > { %4654 = vmatprep.mubr.bf16.mxu1 %v7177_v34  ;;  %v6398_v34 = vld [vmem:[#allocation11 + $0x3d0] ss:$24 sps:$4 sm:$0xff]  }
 0x27e   : > { %4502 = vmatpush1.bf16.msra.mxu0 %v6377_v24  ;;  %v6464_v24 = vld [vmem:[#allocation11 + $0x5e0] ss:$24 sps:$4 sm:$0xff]  }
 0x27f   : > { %4625 = vmatpush1.bf16.msra.mxu1 %v6380_v58  ;;  %4503 = vmatprep.subr.bf16.mxu0 %v6385_v59  ;;  %v6469_v58 = vld [vmem:[#allocation11 + $0x60c] ss:$24 sps:$4 sm:$0xff]  }
 0x280   : > { %4626 = vmatprep.subr.bf16.mxu1 %v6388_v60  ;;  %v6472_v59 = vld [vmem:[#allocation11 + $0x614] ss:$24 sps:$4 sm:$0xff]   ;;  %v6467_v60 = vld [vmem:[#allocation11 + $0x608] ss:$24 sps:$4 sm:$0xff]  }
 0x282   : > { %4504 = vmatpush1.bf16.msra.mxu0 %v6383_v61  ;;  %v6470_v61 = vld [vmem:[#allocation11 + $0x610] ss:$24 sps:$4 sm:$0xff]  }
 0x283   : > { %4627 = vmatpush1.bf16.msra.mxu1 %v6386_v62  ;;  %4505 = vmatprep.subr.bf16.mxu0 %v6391_v63  ;;  %v6475_v62 = vld [vmem:[#allocation11 + $0x63c] ss:$24 sps:$4 sm:$0xff]  }
 0x284   : > { %4628 = vmatprep.subr.bf16.mxu1 %v6394_v28  ;;  %v6478_v63 = vld [vmem:[#allocation11 + $0x644] ss:$24 sps:$4 sm:$0xff]   ;;  %v6473_v28 = vld [vmem:[#allocation11 + $0x638] ss:$24 sps:$4 sm:$0xff]  }
 0x286   : > { %4506 = vmatpush1.bf16.msra.mxu0 %v6389_v4  ;;  %v6476_v4 = vld [vmem:[#allocation11 + $0x640] ss:$24 sps:$4 sm:$0xff]  }
 0x287   : > { %4629 = vmatpush1.bf16.msra.mxu1 %v6392_v6  ;;  %4507 = vmatprep.subr.bf16.mxu0 %v6397_v7  ;;  %v6481_v6 = vld [vmem:[#allocation11 + $0x66c] ss:$24 sps:$4 sm:$0xff]  }
 0x288   : > { %4630 = vmatprep.subr.bf16.mxu1 %v6400_v8  ;;  %v6484_v7 = vld [vmem:[#allocation11 + $0x674] ss:$24 sps:$4 sm:$0xff]   ;;  %v6479_v8 = vld [vmem:[#allocation11 + $0x668] ss:$24 sps:$4 sm:$0xff]  }
 0x28a   : > { %4508 = vmatpush1.bf16.msra.mxu0 %v6395_v10  ;;  %v6482_v10 = vld [vmem:[#allocation11 + $0x670] ss:$24 sps:$4 sm:$0xff]  }
 0x28b   : > { %4631 = vmatpush1.bf16.msra.mxu1 %v6398_v34  ;;  %4509 = vmatprep.subr.bf16.mxu0 %v6403_v11  ;;  %v6487_v34 = vld [vmem:[#allocation11 + $0x69c] ss:$24 sps:$4 sm:$0xff]   ;;  %v6485_v11 = vld [vmem:[#allocation11 + $0x698] ss:$24 sps:$4 sm:$0xff]  }
 0x28c   : > { %4632 = vmatprep.subr.bf16.mxu1 %v6406_v12  ;;  %v6488_v12 = vld [vmem:[#allocation11 + $0x6a0] ss:$24 sps:$4 sm:$0xff]  }
 0x28e   : > { %4510 = vmatpush1.bf16.msra.mxu0 %v6401_v14  ;;  %v6493_v14 = vld [vmem:[#allocation11 + $0x6cc] ss:$24 sps:$4 sm:$0xff]  }
 0x28f   : > { %4633 = vmatpush1.bf16.msra.mxu1 %v6404_v16  ;;  %4511 = vmatprep.subr.bf16.mxu0 %v6409_v17  ;;  %v6496_v16 = vld [vmem:[#allocation11 + $0x6d4] ss:$24 sps:$4 sm:$0xff]   ;;  %v6491_v17 = vld [vmem:[#allocation11 + $0x6c8] ss:$24 sps:$4 sm:$0xff]  }
 0x290   : > { %4634 = vmatprep.subr.bf16.mxu1 %v6412_v18  ;;  %v6499_v18 = vld [vmem:[#allocation11 + $0x6fc] ss:$24 sps:$4 sm:$0xff]  }
 0x292   : > { %4512 = vmatpush1.bf16.msra.mxu0 %v6407_v20  ;;  %v6502_v20 = vld [vmem:[#allocation11 + $0x704] ss:$24 sps:$4 sm:$0xff]  }
 0x293   : > { %4635 = vmatpush1.bf16.msra.mxu1 %v6410_v22  ;;  %4513 = vmatprep.subr.bf16.mxu0 %v6415_v23  ;;  %v6497_v22 = vld [vmem:[#allocation11 + $0x6f8] ss:$24 sps:$4 sm:$0xff]  }
 0x294   : > { %4636 = vmatprep.subr.bf16.mxu1 %v6418_v25  ;;  %v6500_v23 = vld [vmem:[#allocation11 + $0x700] ss:$24 sps:$4 sm:$0xff]   ;;  %v6505_v25 = vld [vmem:[#allocation11 + $0x72c] ss:$24 sps:$4 sm:$0xff]  }
 0x296   : > { %4514 = vmatpush1.bf16.msra.mxu0 %v6413_v13  ;;  %v6508_v13 = vld [vmem:[#allocation11 + $0x734] ss:$24 sps:$4 sm:$0xff]  }
 0x297   : > { %4637 = vmatpush1.bf16.msra.mxu1 %v6416_v26  ;;  %4515 = vmatprep.subr.bf16.mxu0 %v6421_v27  ;;  %v6503_v26 = vld [vmem:[#allocation11 + $0x728] ss:$24 sps:$4 sm:$0xff]  }
 0x298   : > { %4638 = vmatprep.subr.bf16.mxu1 %v6424_v31  ;;  %v6506_v27 = vld [vmem:[#allocation11 + $0x730] ss:$24 sps:$4 sm:$0xff]   ;;  %v6511_v31 = vld [vmem:[#allocation11 + $0x75c] ss:$24 sps:$4 sm:$0xff]  }
 0x29a   : > { %4516 = vmatpush1.bf16.msra.mxu0 %v6419_v32  ;;  %v6514_v32 = vld [vmem:[#allocation11 + $0x764] ss:$24 sps:$4 sm:$0xff]  }
 0x29b   : > { %4639 = vmatpush1.bf16.msra.mxu1 %v6422_v33  ;;  %4517 = vmatprep.subr.bf16.mxu0 %v6427_v21  ;;  %v6509_v33 = vld [vmem:[#allocation11 + $0x758] ss:$24 sps:$4 sm:$0xff]  }
 0x29c   : > { %4640 = vmatprep.subr.bf16.mxu1 %v6430_v35  ;;  %v6512_v21 = vld [vmem:[#allocation11 + $0x760] ss:$24 sps:$4 sm:$0xff]   ;;  %v6517_v35 = vld [vmem:[#allocation11 + $0x78c] ss:$24 sps:$4 sm:$0xff]  }
 0x29e   : > { %4518 = vmatpush1.bf16.msra.mxu0 %v6425_v36  ;;  %v6520_v36 = vld [vmem:[#allocation11 + $0x794] ss:$24 sps:$4 sm:$0xff]  }
 0x29f   : > { %4641 = vmatpush1.bf16.msra.mxu1 %v6428_v38  ;;  %4519 = vmatprep.subr.bf16.mxu0 %v6433_v5  ;;  %v6515_v38 = vld [vmem:[#allocation11 + $0x788] ss:$24 sps:$4 sm:$0xff]  }
 0x2a0   : > { %4642 = vmatprep.subr.bf16.mxu1 %v6436_v39  ;;  %v6518_v5 = vld [vmem:[#allocation11 + $0x790] ss:$24 sps:$4 sm:$0xff]   ;;  %v6523_v39 = vld [vmem:[#allocation11 + $0x7bc] ss:$24 sps:$4 sm:$0xff]  }
 0x2a2   : > { %4520 = vmatpush1.bf16.msra.mxu0 %v6431_v40  ;;  %v6526_v40 = vld [vmem:[#allocation11 + $0x7c4] ss:$24 sps:$4 sm:$0xff]  }
 0x2a3   : > { %4643 = vmatpush1.bf16.msra.mxu1 %v6434_v29  ;;  %4521 = vmatprep.subr.bf16.mxu0 %v6439_v42  ;;  %v6521_v29 = vld [vmem:[#allocation11 + $0x7b8] ss:$24 sps:$4 sm:$0xff]  }
 0x2a4   : > { %4644 = vmatprep.subr.bf16.mxu1 %v6442_v43  ;;  %v6524_v42 = vld [vmem:[#allocation11 + $0x7c0] ss:$24 sps:$4 sm:$0xff]   ;;  %v6529_v43 = vld [vmem:[#allocation11 + $0x7ec] ss:$24 sps:$4 sm:$0xff]  }
 0x2a6   : > { %4522 = vmatpush1.bf16.msra.mxu0 %v6437_v44  ;;  %v6532_v44 = vld [vmem:[#allocation11 + $0x7f4] ss:$24 sps:$4 sm:$0xff]  }
 0x2a7   : > { %4645 = vmatpush1.bf16.msra.mxu1 %v6440_v45  ;;  %4523 = vmatprep.subr.bf16.mxu0 %v6445_v9  ;;  %v6527_v45 = vld [vmem:[#allocation11 + $0x7e8] ss:$24 sps:$4 sm:$0xff]  }
 0x2a8   : > { %4646 = vmatprep.subr.bf16.mxu1 %v6448_v46  ;;  %v6530_v9 = vld [vmem:[#allocation11 + $0x7f0] ss:$24 sps:$4 sm:$0xff]   ;;  %v6535_v46 = vld [vmem:[#allocation11 + $0x81c] ss:$24 sps:$4 sm:$0xff]  }
 0x2aa   : > { %4524 = vmatpush1.bf16.msra.mxu0 %v6443_v47  ;;  %v6538_v47 = vld [vmem:[#allocation11 + $0x824] ss:$24 sps:$4 sm:$0xff]  }
 0x2ab   : > { %4647 = vmatpush1.bf16.msra.mxu1 %v6446_v49  ;;  %4525 = vmatprep.subr.bf16.mxu0 %v6451_v37  ;;  %v6533_v49 = vld [vmem:[#allocation11 + $0x818] ss:$24 sps:$4 sm:$0xff]  }
 0x2ac   : > { %4648 = vmatprep.subr.bf16.mxu1 %v6454_v50  ;;  %v6536_v37 = vld [vmem:[#allocation11 + $0x820] ss:$24 sps:$4 sm:$0xff]   ;;  %v6541_v50 = vld [vmem:[#allocation11 + $0x84c] ss:$24 sps:$4 sm:$0xff]  }
 0x2ae   : > { %4526 = vmatpush1.bf16.msra.mxu0 %v6449_v51  ;;  %v6544_v51 = vld [vmem:[#allocation11 + $0x854] ss:$24 sps:$4 sm:$0xff]  }
 0x2af   : > { %4649 = vmatpush1.bf16.msra.mxu1 %v6452_v15  ;;  %4527 = vmatprep.subr.bf16.mxu0 %v6457_v19  ;;  %v6539_v15 = vld [vmem:[#allocation11 + $0x848] ss:$24 sps:$4 sm:$0xff]  }
 0x2b0   : > { %4650 = vmatprep.subr.bf16.mxu1 %v6460_v52  ;;  %v6542_v19 = vld [vmem:[#allocation11 + $0x850] ss:$24 sps:$4 sm:$0xff]   ;;  %v6547_v52 = vld [vmem:[#allocation11 + $0x87c] ss:$24 sps:$4 sm:$0xff]  }
 0x2b2   : > { %4528 = vmatpush1.bf16.msra.mxu0 %v6455_v53  ;;  %v6550_v53 = vld [vmem:[#allocation11 + $0x884] ss:$24 sps:$4 sm:$0xff]  }
 0x2b3   : > { %4651 = vmatpush1.bf16.msra.mxu1 %v6458_v54  ;;  %4529 = vmatprep.subr.bf16.mxu0 %v6463_v55  ;;  %v6545_v54 = vld [vmem:[#allocation11 + $0x878] ss:$24 sps:$4 sm:$0xff]  }
 0x2b4   : > { %4652 = vmatprep.subr.bf16.mxu1 %v6466_v56  ;;  %v6548_v55 = vld [vmem:[#allocation11 + $0x880] ss:$24 sps:$4 sm:$0xff]   ;;  %v6553_v56 = vld [vmem:[#allocation11 + $0x8ac] ss:$24 sps:$4 sm:$0xff]  }
 0x2b6   : > { %4530 = vmatpush1.bf16.msra.mxu0 %v6461_v57  ;;  %v6556_v57 = vld [vmem:[#allocation11 + $0x8b4] ss:$24 sps:$4 sm:$0xff]  }
 0x2b7   : > { %4653 = vmatpush1.bf16.msra.mxu1 %v6464_v24  ;;  %4540 = vmatprep.subr.bf16.mxu0 %v6469_v58  ;;  %v6551_v24 = vld [vmem:[#allocation11 + $0x8a8] ss:$24 sps:$4 sm:$0xff]  }
 0x2b8   : > { %4663 = vmatprep.subr.bf16.mxu1 %v6472_v59  ;;  %v6554_v58 = vld [vmem:[#allocation11 + $0x8b0] ss:$24 sps:$4 sm:$0xff]   ;;  %v691_v59 = vlaneseq }
 0x2b9   : > { %4532 = vmatmul.mubr.bf16.vlgmr.msra.gmra.mrb[8].mxu0 %v7188_v48 }
 0x2ba   : > { %4655 = vmatmul.mubr.bf16.vlgmr.msra.gmra.mrb[8].mxu1 %v7188_v48  ;;  %4541 = vmatpush1.bf16.msra.mxu0 %v6467_v60  ;;  %v6490_v48 = vld [vmem:[#allocation11 + $0x6a4] ss:$24 sps:$4 sm:$0xff]  }
 0x2bb   : > { %4664 = vmatpush1.bf16.msra.mxu1 %v6470_v61  ;;  %4542 = vmatprep.subr.bf16.mxu0 %v6475_v62  ;;  %v6559_v60 = vld [vmem:[#allocation11 + $0x8dc] ss:$24 sps:$4 sm:$0xff]   ;;  %v6557_v62 = vld [vmem:[#allocation11 + $0x8d8] ss:$24 sps:$4 sm:$0xff]  }
 0x2bc   : > { %4665 = vmatprep.subr.bf16.mxu1 %v6478_v63  ;;  %4572 = vmatprep.mubr.bf16.mxu0 %v7192_v41  ;;  %v6562_v61 = vld [vmem:[#allocation11 + $0x8e4] ss:$24 sps:$4 sm:$0xff]   ;;  %v6560_v63 = vld [vmem:[#allocation11 + $0x8e0] ss:$24 sps:$4 sm:$0xff]  }
 0x2bd   : > { %4695 = vmatprep.mubr.bf16.mxu1 %v7192_v41  ;;  %v6494_v41 = vld [vmem:[#allocation11 + $0x6d0] ss:$24 sps:$4 sm:$0xff]  }
 0x2be   : > { %4543 = vmatpush1.bf16.msra.mxu0 %v6473_v28  ;;  %v7222_v28 = vshrl.u32 %v691_v59, 7 }
 0x2bf   : > { %4666 = vmatpush1.bf16.msra.mxu1 %v6476_v4  ;;  %4544 = vmatprep.subr.bf16.mxu0 %v6481_v6 }
 0x2c0   : > { %4667 = vmatprep.subr.bf16.mxu1 %v6484_v7  ;;  %v693_v4 = vsub.s32 0, %v7222_v28  ;;  %v697_v6 = vsub.s32 1, %v7222_v28  ;;  %v689_v7 = vld [vmem:[#allocation9] sm:$0x3f] }
 0x2c2   : > { %4545 = vmatpush1.bf16.msra.mxu0 %v6479_v8  ;;  %v694_v8 = vrot.slane %v689_v7, %v693_v4 }
 0x2c3   : > { %4668 = vmatpush1.bf16.msra.mxu1 %v6482_v10  ;;  %4546 = vmatprep.subr.bf16.mxu0 %v6487_v34  ;;  %v698_v10 = vrot.slane %v689_v7, %v697_v6  ;;  %v701_v34 = vsub.s32 2, %v7222_v28 }
 0x2c4   : > { %4669 = vmatprep.subr.bf16.mxu1 %v6490_v48  ;;  %v5519_v48 = vadd.f32 %v7206_v0, %v694_v8 }
 0x2c6   : > { %4547 = vmatpush1.bf16.msra.mxu0 %v6485_v11  ;;  %v5520_v11 = vadd.f32 %v7210_v2, %v698_v10 }
 0x2c7   : > { %4670 = vmatpush1.bf16.msra.mxu1 %v6488_v12  ;;  %4548 = vmatprep.subr.bf16.mxu0 %v6493_v14  ;;  %v702_v12 = vrot.slane %v689_v7, %v701_v34  ;;  %v705_v14 = vsub.s32 3, %v7222_v28 }
 0x2c8   : > { %4671 = vmatprep.subr.bf16.mxu1 %v6496_v16  ;;  %v4710_v16 = vmul.f32 %v5519_v48, %v5519_v48 }
 0x2ca   : > { %4549 = vmatpush1.bf16.msra.mxu0 %v6491_v17  ;;  %v4711_v17 = vmul.f32 %v5520_v11, %v5520_v11 }
 0x2cb   : > { %4672 = vmatpush1.bf16.msra.mxu1 %v6494_v41  ;;  %4550 = vmatprep.subr.bf16.mxu0 %v6499_v18  ;;  %v5521_v41 = vadd.f32 %v7208_v1, %v702_v12  ;;  %v706_v18 = vrot.slane %v689_v7, %v705_v14 }
 0x2cc   : > { %4673 = vmatprep.subr.bf16.mxu1 %v6502_v20  ;;  %v709_v20 = vsub.s32 4, %v7222_v28 }
 0x2ce   : > { %4551 = vmatpush1.bf16.msra.mxu0 %v6497_v22  ;;  %v2842_v22 = vld [vmem:[#allocation12] sm:$0x3f]  ;;  %v710_v0 = vrot.slane %v689_v7, %v709_v20 }
 0x2cf   : > { %4674 = vmatpush1.bf16.msra.mxu1 %v6500_v23  ;;  %4552 = vmatprep.subr.bf16.mxu0 %v6505_v25  ;;  %v4729_v23 = vadd.f32 %v4711_v17, %v4710_v16  ;;  %v4712_v25 = vmul.f32 %v5521_v41, %v5521_v41 }
 0x2d0   : > { %4675 = vmatprep.subr.bf16.mxu1 %v6508_v13  ;;  %v5522_v13 = vadd.f32 %v7212_v3, %v706_v18 }
 0x2d2   : > { %4553 = vmatpush1.bf16.msra.mxu0 %v6503_v26  ;;  %v2847_v26 = vrot.slane %v2842_v22, %v693_v4 }
 0x2d3   : > { %4676 = vmatpush1.bf16.msra.mxu1 %v6506_v27  ;;  %4554 = vmatprep.subr.bf16.mxu0 %v6511_v31  ;;  %v2851_v27 = vrot.slane %v2842_v22, %v697_v6  ;;  %v4730_v31 = vadd.f32 %v4729_v23, %v4712_v25 }
 0x2d4   : > { %4677 = vmatprep.subr.bf16.mxu1 %v6514_v32 }
 0x2d6   : > { %4555 = vmatpush1.bf16.msra.mxu0 %v6509_v33 }
 0x2d7   : > { %4678 = vmatpush1.bf16.msra.mxu1 %v6512_v21  ;;  %4556 = vmatprep.subr.bf16.mxu0 %v6517_v35  ;;  %v4713_v21 = vmul.f32 %v5522_v13, %v5522_v13 }
 0x2d8   : > { %4679 = vmatprep.subr.bf16.mxu1 %v6520_v36 }
 0x2da   : > { %4557 = vmatpush1.bf16.msra.mxu0 %v6515_v38 }
 0x2db   : > { %4680 = vmatpush1.bf16.msra.mxu1 %v6518_v5  ;;  %4558 = vmatprep.subr.bf16.mxu0 %v6523_v39 }
 0x2dc   : > { %4681 = vmatprep.subr.bf16.mxu1 %v6526_v40 }
 0x2de   : > { %4559 = vmatpush1.bf16.msra.mxu0 %v6521_v29 }
 0x2df   : > { %4682 = vmatpush1.bf16.msra.mxu1 %v6524_v42  ;;  %4560 = vmatprep.subr.bf16.mxu0 %v6529_v43 }
 0x2e0   : > { %4683 = vmatprep.subr.bf16.mxu1 %v6532_v44 }
 0x2e2   : > { %4561 = vmatpush1.bf16.msra.mxu0 %v6527_v45 }
 0x2e3   : > { %4684 = vmatpush1.bf16.msra.mxu1 %v6530_v9  ;;  %4562 = vmatprep.subr.bf16.mxu0 %v6535_v46  ;;  %v4731_v9 = vadd.f32 %v4730_v31, %v4713_v21 }
 0x2e4   : > { %4685 = vmatprep.subr.bf16.mxu1 %v6538_v47 }
 0x2e6   : > { %4563 = vmatpush1.bf16.msra.mxu0 %v6533_v49 }
 0x2e7   : > { %4686 = vmatpush1.bf16.msra.mxu1 %v6536_v37  ;;  %4564 = vmatprep.subr.bf16.mxu0 %v6541_v50 }
 0x2e8   : > { %4687 = vmatprep.subr.bf16.mxu1 %v6544_v51 }
 0x2ea   : > { %4565 = vmatpush1.bf16.msra.mxu0 %v6539_v15 }
 0x2eb   : > { %4688 = vmatpush1.bf16.msra.mxu1 %v6542_v19  ;;  %4566 = vmatprep.subr.bf16.mxu0 %v6547_v52  ;;  %v2855_v19 = vrot.slane %v2842_v22, %v701_v34  ;;  %v2859_v52 = vrot.slane %v2842_v22, %v705_v14 }
 0x2ec   : > { %4689 = vmatprep.subr.bf16.mxu1 %v6550_v53  ;;  %v2863_v53 = vrot.slane %v2842_v22, %v709_v20 }
 0x2ee   : > { %4567 = vmatpush1.bf16.msra.mxu0 %v6545_v54 }
 0x2ef   : > { %4690 = vmatpush1.bf16.msra.mxu1 %v6548_v55  ;;  %4568 = vmatprep.subr.bf16.mxu0 %v6553_v56 }
 0x2f0   : > { %4691 = vmatprep.subr.bf16.mxu1 %v6556_v57 }
 0x2f2   : > { %4569 = vmatpush1.bf16.msra.mxu0 %v6551_v24 }
 0x2f3   : > { %4692 = vmatpush1.bf16.msra.mxu1 %v6554_v58  ;;  %4570 = vmatprep.subr.bf16.mxu0 %v6559_v60 }
 0x2f4   : > { %4693 = vmatprep.subr.bf16.mxu1 %v6562_v61 }
 0x2f6   : > { %4571 = vmatpush1.bf16.msra.mxu0 %v6557_v62 }
 0x2f7   : > { %4694 = vmatpush1.bf16.msra.mxu1 %v6560_v63 }
 0x2f9   : > { %4573 = vmatmul.mubr.bf16.vlgmr.msra.gmra.mrb[8].mxu0 %v7200_v30 }
 0x2fa   : > { %4696 = vmatmul.mubr.bf16.vlgmr.msra.gmra.mrb[8].mxu1 %v7200_v30  ;;  %v713_v30 = vsub.s32 5, %v7222_v28 }
 0x2fc   : > { %v714_v2 = vrot.slane %v689_v7, %v713_v30  ;;  %v2867_v24 = vrot.slane %v2842_v22, %v713_v30 }
 0x30c   : > { %v2544_v32 = vpop.f32.mrb[4].mxu0 }
 0x30d   : > { %v4451_v33 = vpop.f32.mrb[4].mxu1  ;;  %v5523_v35 = vadd.f32 %v2544_v32, %v710_v0  ;;  %v2546_v36 = vpop.f32.mrb[5].mxu0  ;;  %v4753_v32 = vld [vmem:[%s391_s13] sm:$0xff] }
 0x30e   : > { %v5525_v1 = vadd.f32 %v4451_v33, %v2847_v26  ;;  %v4453_v38 = vpop.f32.mrb[5].mxu1  ;;  %v5524_v5 = vadd.f32 %v2546_v36, %v714_v2  ;;  %v2548_v40 = vpop.f32.mrb[6].mxu0  ;;  %v4750_v2 = vstv %s5513_s29 }
 0x30f   : > { %v5526_v39 = vadd.f32 %v4453_v38, %v2851_v27  ;;  %v4455_v29 = vpop.f32.mrb[6].mxu1  ;;  %v4714_v42 = vmul.f32 %v5523_v35, %v5523_v35  ;;  %v2549_v3 = vpop.f32.mrb[7].mxu0  ;;  %v4751_v27 = vadd.s32 %v4750_v2, %v7222_v28 }
 0x310   : > { %v4704_v43 = vmul.f32 %v5525_v1, %v5519_v48  ;;  %v4716_v44 = vmul.f32 %v5525_v1, %v5525_v1  ;;  %v4456_v45 = vpop.f32.mrb[7].mxu1  ;;  %v4715_v49 = vmul.f32 %v5524_v5, %v5524_v5 }
 0x311   : > { %v4705_v46 = vmul.f32 %v5526_v39, %v5520_v11  ;;  %v4717_v47 = vmul.f32 %v5526_v39, %v5526_v39  ;;  %v4732_v37 = vadd.f32 %v4731_v9, %v4714_v42  ;;  %vm4752_vm0 = vcmp.lt.s32.totalorder %v4751_v27, 16 }
 0x313   : > { %v4722_v50 = vadd.f32 %v4705_v46, %v4704_v43  ;;  %v4736_v51 = vadd.f32 %v4717_v47, %v4716_v44  ;;  %v4733_v15 = vadd.f32 %v4732_v37, %v4715_v49 }
 0x315   : > { %4734 = vadd.xlane.f32.xlu0 %v4733_v15 }
 0x3a2   : > { %v4735_v25 = vpop.xlane.xlu0 %4734 }
 0x3cc   : > { %v4574_v54 = vpop.f32.mrb[8].mxu0 }
 0x3cd   : > { %v4697_v55 = vpop.f32.mrb[8].mxu1  ;;  %v5527_v56 = vadd.f32 %v4574_v54, %v2855_v19  ;;  %v4576_v57 = vpop.f32.mrb[9].mxu0 }
 0x3ce   : > { %v4699_v58 = vpop.f32.mrb[9].mxu1  ;;  %v5528_v59 = vadd.f32 %v4576_v57, %v2859_v52  ;;  %v4578_v60 = vpop.f32.mrb[10].mxu0  ;;  %v5529_v4 = vadd.f32 %v4697_v55, %v2863_v53 }
 0x3cf   : > { %v4701_v61 = vpop.f32.mrb[10].mxu1  ;;  %v4706_v62 = vmul.f32 %v5527_v56, %v5521_v41  ;;  %v4718_v63 = vmul.f32 %v5527_v56, %v5527_v56  ;;  %v4579_v6 = vpop.f32.mrb[11].mxu0  ;;  %v5530_v11 = vadd.f32 %v4699_v58, %v2867_v24 }
 0x3d0   : > { %v4702_v7 = vpop.f32.mrb[11].mxu1  ;;  %v4707_v8 = vmul.f32 %v5528_v59, %v5522_v13  ;;  %v4719_v10 = vmul.f32 %v5528_v59, %v5528_v59  ;;  %v4708_v12 = vmul.f32 %v5529_v4, %v5523_v35  ;;  %v4720_v14 = vmul.f32 %v5529_v4, %v5529_v4 }
 0x3d1   : > { %v4723_v48 = vadd.f32 %v4722_v50, %v4706_v62  ;;  %v4737_v34 = vadd.f32 %v4736_v51, %v4718_v63  ;;  %v4721_v18 = vmul.f32 %v5530_v11, %v5530_v11  ;;  %v4709_v22 = vmul.f32 %v5530_v11, %v5524_v5 }
 0x3d3   : > { %v4738_v16 = vadd.f32 %v4737_v34, %v4719_v10  ;;  %v4724_v17 = vadd.f32 %v4723_v48, %v4707_v8 }
 0x3d5   : > { %v4739_v20 = vadd.f32 %v4738_v16, %v4720_v14  ;;  %v4725_v41 = vadd.f32 %v4724_v17, %v4708_v12 }
 0x3d7   : > { %v4740_v30 = vadd.f32 %v4739_v20, %v4721_v18  ;;  %v4726_v23 = vadd.f32 %v4725_v41, %v4709_v22 }
 0x3d9   : > { %4741 = vadd.xlane.f32.xlu0 %v4740_v30  ;;  %4727 = vadd.xlane.f32.xlu1 %v4726_v23 }
 0x466   : > { %v4742_v13 = vpop.xlane.xlu0 %4741  ;;  %v4728_v33 = vpop.xlane.xlu1 %4727 }
 0x467   : > { %v4743_v0 = vmul.f32 %v4742_v13, %v4735_v25 }
 0x469   : > { %v4744_v26 = vmax.f32 %v4743_v0, 1e-16 }
 0x46b   : > { %6563 = vrsqrt.f32 %v4744_v26 }
 0x475   : > { %v6564_v31 = vpop.eup %6563 }
 0x476   : > { %v4746_v21 = vmul.f32 %v6564_v31, %v4728_v33 }
 0x478   : > { %v4754_v35 = vsub.f32 %v4746_v21, %v4753_v32 }
 0x47a   : > { %v4755_v1 = vsel %vm4752_vm0, %v4754_v35, 0.0 }
 0x47b   : > { %v4757_v36 = vmul.f32 %v4755_v1, %v4755_v1 }
 0x47d   : > { %v4759_v38 = vsel %vm4758_vm1, %v4757_v36, 0.0 }
 0x47e   : > { %4760 = vadd.xlane.f32.xlu1 %v4759_v38 }
 0x50b   : > { %v4761_v5 = vpop.xlane.xlu1 %4760 }
 0x50c   : > { %v4762_v39 = vrot.slane %v4761_v5, 4 }
 0x50e   : > { %v4763_v28 = vadd.f32 %v4762_v39, %v4761_v5 }
 0x510   : > { %v4764_v40 = vrot.slane %v4763_v28, 2 }
 0x512   : > { %v4765_v29 = vadd.f32 %v4764_v40, %v4763_v28 }
 0x514   : > { %v4766_v42 = vrot.slane %v4765_v29, 1 }
 0x516   : > { %v4767_v43 = vadd.f32 %v4766_v42, %v4765_v29 }
 0x518   : > { %5584 = vpush %v4767_v43 }
 0x549   : > { %s5585_s12 = spop %5584 }
 0x54a   : > { %s4769_s17 = sadd.f32 %s5585_s12, %s4756_s27 }
 0x54c   : > { %4771 = sst [smem:[#allocation2]] %s4769_s17  ;;  %s4777_s23 = smul.f32 0.0625, %s4769_s17 }
 0x54e   : > { %5609 = sst [smem:[#allocation14]] (%p5644_p11), %s4777_s23 }
 0x54f   : > { %6748 = shalt.err (!%p6745_p9)
}
 0x550   : > { %s6814_s8 = smov [#allocation14]  }
 0x551   : > { %5611 = dma.smem_to_hbm (%p5644_p11), %s6814_s8, 16, %s7288_s7, [#allocation5]  }
 0x552   : > { %6786 = dma.done.wait (%p5644_p11), [#allocation5], 16  }
 0x553   : > { %6788 = vsyncadd (%p5644_p11), [#allocation5], 4294967280 }
 0x554   : > { %4793 = sfence }
 0x555 PF: > { %p23_p6 = scmp.ge.s32.totalorder %s6999_s19, 4   ;;  %s7307_s24 = smov %s6795_s25 }
 0x556   : > { %s7308_s25 = smov %s6799_s26  ;;  %s7309_s26 = smov %s7011_s21 }
 0x557   : > { %s7310_s27 = smov %s6999_s19  ;;  %25 = sbr.rel (!%p23_p6) target bundleno = 8 (0x8), region = 128 }
 0x55e   :  { %4799 = vsyncpa [#allocation4], 1 }
 0x55f   :  { %4801 = vsyncpa [#allocation4 + $0x1], 1 }
 0x560   :  { %4802 = vsyncpa [#allocation7], 1 }
 0x561   :  { %4804 = vsyncpa [#allocation7 + $0x1], 1 }
 0x562   :  { %4805 = vsyncpa [#allocation10], 1 }
 0x563   :  { %4806 = vsyncpa [#allocation13], 1 }
 0x564   :  { %4807 = vsyncpa [#allocation5], 1 }
 0x565   :  { %4809 = vsyncpa [#allocation5 + $0x1], 1 }

</bundles_post_ra>
